<compile_context>
chip_gen: v6e
topology: v6e:2x2x1
jax: 0.10.0
libtpu: 0.0.40
codegen_flags: <defaults>
</compile_context>

<pallas_src>
import functools

import jax
import jax.numpy as jnp
from jax.experimental import pallas as pl
from jax.experimental.pallas import tpu as pltpu


def _round_up(x, m):
    return (x + m - 1) // m * m


def _painn_interaction_kernel(qmu_ref, w5_ref, idx_i_ref, idx_j_ref,
                              w1_ref, b1_ref, w2_ref, b2_ref,
                              out_ref, slab_ref):
    fp = w1_ref.shape[0]          # padded feature width (multiple of 128)
    na = qmu_ref.shape[0]         # padded atom count (all atoms, resident)
    ta = out_ref.shape[0]         # atoms handled by this output block
    tp = w5_ref.shape[0]          # pair-tile size
    a = pl.program_id(0)          # atom block (parallel axis)

    @pl.when(pl.program_id(1) == 0)
    def _init():
        # Atom-level context MLP: Dense(F,F)+SiLU, Dense(F,3F).  Runs once per
        # atom block (not per pair tile) and lands in a persistent VMEM slab.
        q = qmu_ref[:, :fp]
        h = jnp.dot(q, w1_ref[...], preferred_element_type=jnp.float32) + b1_ref[...]
        h = h * jax.nn.sigmoid(h)                                         # SiLU
        x = jnp.dot(h, w2_ref[...], preferred_element_type=jnp.float32) + b2_ref[...]
        slab_ref[:, :3 * fp] = x                                          # [xq | xR | xm]
        slab_ref[:, 3 * fp:] = qmu_ref[:, fp:]                            # mu (flat 3*Fp)
        # residual init of the accumulator for this atom block
        row0 = pl.multiple_of(a * ta, 8)
        out_ref[...] = qmu_ref[pl.ds(row0, ta), :]

    # One-hot gather / scatter matrices for this pair tile (built in vregs).
    gj = (jax.lax.broadcasted_iota(jnp.int32, (tp, na), 1)
          == idx_j_ref[...]).astype(jnp.float32)                          # (TP, NA)
    giT = ((jax.lax.broadcasted_iota(jnp.int32, (ta, tp), 0) + a * ta)
           == idx_i_ref[...]).astype(jnp.float32)                         # (TA, TP)

    # Fused gather: one MXU matmul pulls x and mu for all pairs of the tile.
    g = jnp.dot(gj, slab_ref[...], preferred_element_type=jnp.float32)    # (TP, 6*Fp)
    xq_j = g[:, :fp]
    xr_j = g[:, fp:2 * fp]
    xm_j = g[:, 2 * fp:3 * fp]

    w5 = w5_ref[...]                                                      # (TP, 5*Fp)
    dq = w5[:, :fp] * xq_j                                                # Wq * xj
    t = w5[:, 4 * fp:] * xm_j                                             # Wm * xj (dmumu)
    # dmu per spatial component: (WR*dir_c)*xr_j + (Wm*xm_j)*mu_c
    dmu = [w5[:, (1 + c) * fp:(2 + c) * fp] * xr_j
           + t * g[:, (3 + c) * fp:(4 + c) * fp] for c in range(3)]

    # Fused scatter-add: one MXU matmul accumulates dq and all three mu components.
    payload = jnp.concatenate([dq] + dmu, axis=1)                         # (TP, 4*Fp)
    out_ref[...] += jnp.dot(giT, payload, preferred_element_type=jnp.float32)


def painn_interaction(q, mu, Wij, dir_ij, idx_i, idx_j, n_atoms, params, *,
                      pair_tile=256, atom_blocks=1):
    """q: (n_atoms,1,F), mu: (n_atoms,3,F), Wij: (n_pairs,1,3F), dir_ij: (n_pairs,3).

    atom_blocks: set to 2 on v7x to shard the output across both TensorCores.
    """
    feat = q.shape[-1]
    n_pairs = idx_i.shape[0]
    f32 = jnp.float32

    fp = _round_up(feat, 128)                       # lane-dense feature width
    na = _round_up(n_atoms, 8 * atom_blocks)        # padded atom count
    ta = na // atom_blocks
    tp = _round_up(pair_tile, 128)                  # pair tile (lane constraint on idx_i)
    np_pad = _round_up(max(n_pairs, tp), tp)

    def padf(x, rows, cols):
        return jnp.zeros((rows, cols), f32).at[:x.shape[0], :x.shape[1]].set(x.astype(f32))

    # Fused atom input: [q | mu_x | mu_y | mu_z]  -> (na, 4*Fp)
    q2 = padf(q.reshape(n_atoms, feat), na, fp)
    mu3 = mu.astype(f32)
    mu_flat = jnp.concatenate([padf(mu3[:, c, :], na, fp) for c in range(3)], axis=1)
    qmu = jnp.concatenate([q2, mu_flat], axis=1)

    # Fused pair filter slab: [Wq | WR*dx | WR*dy | WR*dz | Wm]  -> (np_pad, 5*Fp)
    w3 = Wij.reshape(n_pairs, 3, feat).astype(f32)
    d = dir_ij.astype(f32)
    w5 = jnp.concatenate(
        [padf(w3[:, 0, :], np_pad, fp)]
        + [padf(w3[:, 1, :] * d[:, c:c + 1], np_pad, fp) for c in range(3)]
        + [padf(w3[:, 2, :], np_pad, fp)], axis=1)

    # Indices: padded pairs point at row `na` -> all-zero one-hot row/col (dropped),
    # matching scatter_add drop semantics for out-of-range indices.
    ii = jnp.full((np_pad,), na, jnp.int32).at[:n_pairs].set(idx_i.astype(jnp.int32))
    ij = jnp.full((np_pad,), na, jnp.int32).at[:n_pairs].set(idx_j.astype(jnp.int32))
    ii = ii.reshape(1, np_pad)
    ij = ij.reshape(np_pad, 1)

    # MLP weights, zero-padded so padded lanes stay exactly zero end-to-end.
    w1 = padf(params["w1"], fp, fp)
    b1 = padf(params["b1"].reshape(1, feat), 1, fp)
    w2_3 = params["w2"].reshape(feat, 3, feat)
    w2 = jnp.concatenate([padf(w2_3[:, c, :], fp, fp) for c in range(3)], axis=1)
    b2_3 = params["b2"].reshape(3, feat)
    b2 = jnp.concatenate([padf(b2_3[c:c + 1, :], 1, fp) for c in range(3)], axis=1)

    grid = (atom_blocks, np_pad // tp)
    out = pl.pallas_call(
        _painn_interaction_kernel,
        out_shape=jax.ShapeDtypeStruct((na, 4 * fp), f32),
        grid_spec=pltpu.PrefetchScalarGridSpec(
            num_scalar_prefetch=0,
            grid=grid,
            in_specs=[
                pl.BlockSpec((na, 4 * fp), lambda a, p: (0, 0)),   # qmu (resident)
                pl.BlockSpec((tp, 5 * fp), lambda a, p: (p, 0)),   # pair filter tile
                pl.BlockSpec((1, tp), lambda a, p: (0, p)),        # idx_i tile
                pl.BlockSpec((tp, 1), lambda a, p: (p, 0)),        # idx_j tile
                pl.BlockSpec((fp, fp), lambda a, p: (0, 0)),       # w1
                pl.BlockSpec((1, fp), lambda a, p: (0, 0)),        # b1
                pl.BlockSpec((fp, 3 * fp), lambda a, p: (0, 0)),   # w2
                pl.BlockSpec((1, 3 * fp), lambda a, p: (0, 0)),    # b2
            ],
            out_specs=pl.BlockSpec((ta, 4 * fp), lambda a, p: (a, 0)),
            scratch_shapes=[pltpu.VMEM((na, 6 * fp), f32)],        # [x | mu_flat]
        ),
        compiler_params=pltpu.CompilerParams(
            dimension_semantics=("parallel", "arbitrary"),
            vmem_limit_bytes=32 * 1024 * 1024,                     # fits v7x's 64 MiB VMEM
        ),
    )(qmu, w5, ii, ij, w1, b1, w2, b2)

    q_new = out[:n_atoms, :feat].reshape(n_atoms, 1, feat)
    mu_new = jnp.stack(
        [out[:n_atoms, (1 + c) * fp:(1 + c) * fp + feat] for c in range(3)], axis=1)
    return q_new, mu_new


def painn_interaction_ref(q, mu, Wij, dir_ij, idx_i, idx_j, n_atoms, params):
    """Pure-JAX reference mirroring the PyTorch forward."""
    feat = q.shape[-1]
    h = q @ params["w1"] + params["b1"]
    h = jax.nn.silu(h)
    x = h @ params["w2"] + params["b2"]                         # (n_atoms, 1, 3F)
    xj = x[idx_j]
    muj = mu[idx_j]
    xw = Wij * xj
    dq, dmur, dmumu = jnp.split(xw, 3, axis=-1)
    dq = jnp.zeros((n_atoms, 1, feat), jnp.float32).at[idx_i].add(dq)
    dmu = dmur * dir_ij[..., None] + dmumu * muj
    dmu = jnp.zeros((n_atoms, 3, feat), jnp.float32).at[idx_i].add(dmu)
    return q + dq, mu + dmu


if __name__ == "__main__":
    n_atom_basis = 32
    n_atoms = 8
    n_pairs = 16

    key = jax.random.PRNGKey(0)
    keys = jax.random.split(key, 8)

    # Deterministic synthetic parameters (Dense(F,F)+SiLU, Dense(F,3F); weights stored (in, out)).
    params = {
        "w1": jax.random.normal(keys[0], (n_atom_basis, n_atom_basis), jnp.float32)
              / jnp.sqrt(jnp.float32(n_atom_basis)),
        "b1": 0.1 * jax.random.normal(keys[1], (1, n_atom_basis), jnp.float32),
        "w2": jax.random.normal(keys[2], (n_atom_basis, 3 * n_atom_basis), jnp.float32)
              / jnp.sqrt(jnp.float32(n_atom_basis)),
        "b2": 0.1 * jax.random.normal(keys[3], (1, 3 * n_atom_basis), jnp.float32),
    }

    q = jax.random.normal(keys[4], (n_atoms, 1, n_atom_basis), jnp.float32)
    mu = jax.random.normal(keys[5], (n_atoms, 3, n_atom_basis), jnp.float32)
    Wij = jax.random.normal(keys[6], (n_pairs, 1, 3 * n_atom_basis), jnp.float32)
    dvec = jax.random.normal(keys[7], (n_pairs, 3), jnp.float32)
    dir_ij = dvec / jnp.linalg.norm(dvec, axis=-1, keepdims=True)
    idx_i = jnp.arange(n_pairs, dtype=jnp.int32) % n_atoms
    idx_j = (jnp.arange(n_pairs, dtype=jnp.int32) * 3 + 1) % n_atoms

    # jit the wrapper so the host-side padding / slab construction fuses into one
    # XLA program around the pallas_call (n_atoms is a shape-defining static arg).
    painn_jit = jax.jit(painn_interaction, static_argnums=(6,))

    q_out, mu_out = painn_jit(q, mu, Wij, dir_ij, idx_i, idx_j, n_atoms, params)
    jax.block_until_ready((q_out, mu_out))

    q_ref, mu_ref = painn_interaction_ref(q, mu, Wij, dir_ij, idx_i, idx_j, n_atoms, params)
    assert q_out.shape == (n_atoms, 1, n_atom_basis)
    assert mu_out.shape == (n_atoms, 3, n_atom_basis)
    assert jnp.allclose(q_out, q_ref, atol=1e-4, rtol=1e-3), "q mismatch vs reference"
    assert jnp.allclose(mu_out, mu_ref, atol=1e-4, rtol=1e-3), "mu mismatch vs reference"
    print("KERNEL_OK")
</pallas_src>

<mosaic_0001>
module attributes {stable_mosaic.version = 11 : i64} {
  func.func @_painn_interaction_kernel(%arg0: i32, %arg1: i32, %arg2: memref<8x512xf32, #tpu.memory_space<vmem>>, %arg3: memref<256x640xf32, #tpu.memory_space<vmem>>, %arg4: memref<1x256xi32, #tpu.memory_space<vmem>>, %arg5: memref<256x1xi32, #tpu.memory_space<vmem>>, %arg6: memref<128x128xf32, #tpu.memory_space<vmem>>, %arg7: memref<1x128xf32, #tpu.memory_space<vmem>>, %arg8: memref<128x384xf32, #tpu.memory_space<vmem>>, %arg9: memref<1x384xf32, #tpu.memory_space<vmem>>, %arg10: memref<8x512xf32, #tpu.memory_space<vmem>>, %arg11: memref<8x768xf32, #tpu.memory_space<vmem>>) attributes {dimension_semantics = [#tpu.dimension_semantics<parallel>, #tpu.dimension_semantics<arbitrary>], iteration_bounds = array<i64: 1, 1>, scalar_prefetch = 0 : i64, scratch_operands = 1 : i64, tpu.core_type = #tpu.core_type<tc>, window_params = [{pipeline_mode = #tpu.pipeline_mode<synchronous>, transform_indices = @transform_0, window_bounds = array<i64: 8, 512>}, {transform_indices = @transform_1, window_bounds = array<i64: 256, 640>}, {transform_indices = @transform_2, window_bounds = array<i64: 1, 256>}, {transform_indices = @transform_3, window_bounds = array<i64: 256, 1>}, {pipeline_mode = #tpu.pipeline_mode<synchronous>, transform_indices = @transform_4, window_bounds = array<i64: 128, 128>}, {pipeline_mode = #tpu.pipeline_mode<synchronous>, transform_indices = @transform_5, window_bounds = array<i64: 1, 128>}, {pipeline_mode = #tpu.pipeline_mode<synchronous>, transform_indices = @transform_6, window_bounds = array<i64: 128, 384>}, {pipeline_mode = #tpu.pipeline_mode<synchronous>, transform_indices = @transform_7, window_bounds = array<i64: 1, 384>}, {transform_indices = @transform_8, window_bounds = array<i64: 8, 512>}]} {
    %c0_i32 = arith.constant 0 : i32
    %0 = arith.cmpi eq, %arg1, %c0_i32 : i32
    %1 = arith.extui %0 : i1 to i32
    %c0_i32_0 = arith.constant 0 : i32
    %2 = arith.cmpi ne, %1, %c0_i32_0 : i32
    scf.if %2 {
      %c0_13 = arith.constant 0 : index
      %c0_14 = arith.constant 0 : index
      %48 = vector.load %arg2[%c0_13, %c0_14] : memref<8x512xf32, #tpu.memory_space<vmem>>, vector<8x128xf32>
      %c0_15 = arith.constant 0 : index
      %c0_16 = arith.constant 0 : index
      %49 = vector.load %arg6[%c0_15, %c0_16] : memref<128x128xf32, #tpu.memory_space<vmem>>, vector<128x128xf32>
      %cst_17 = arith.constant dense<0.000000e+00> : vector<8x128xf32>
      %50 = tpu.matmul %48, %49, %cst_17 {dimension_numbers = #tpu.dot_dimension_numbers<[1], [0], [0], [1], [0, 0, 1, 1], [], []>} : vector<8x128xf32>, vector<128x128xf32>, vector<8x128xf32> -> vector<8x128xf32>
      %c0_18 = arith.constant 0 : index
      %c0_19 = arith.constant 0 : index
      %51 = vector.load %arg7[%c0_18, %c0_19] : memref<1x128xf32, #tpu.memory_space<vmem>>, vector<1x128xf32>
      %52 = vector.broadcast %51 : vector<1x128xf32> to vector<8x128xf32>
      %53 = arith.addf %50, %52 : vector<8x128xf32>
      %54 = arith.negf %53 : vector<8x128xf32>
      %55 = math.exp %54 : vector<8x128xf32>
      %cst_20 = arith.constant 1.000000e+00 : f32
      %56 = vector.broadcast %cst_20 : f32 to vector<8x128xf32>
      %57 = arith.addf %56, %55 : vector<8x128xf32>
      %58 = arith.divf %56, %57 : vector<8x128xf32>
      %59 = arith.mulf %53, %58 : vector<8x128xf32>
      %c0_21 = arith.constant 0 : index
      %c0_22 = arith.constant 0 : index
      %60 = vector.load %arg8[%c0_21, %c0_22] : memref<128x384xf32, #tpu.memory_space<vmem>>, vector<128x384xf32>
      %cst_23 = arith.constant dense<0.000000e+00> : vector<8x384xf32>
      %61 = tpu.matmul %59, %60, %cst_23 {dimension_numbers = #tpu.dot_dimension_numbers<[1], [0], [0], [1], [0, 0, 1, 1], [], []>} : vector<8x128xf32>, vector<128x384xf32>, vector<8x384xf32> -> vector<8x384xf32>
      %c0_24 = arith.constant 0 : index
      %c0_25 = arith.constant 0 : index
      %62 = vector.load %arg9[%c0_24, %c0_25] : memref<1x384xf32, #tpu.memory_space<vmem>>, vector<1x384xf32>
      %63 = vector.broadcast %62 : vector<1x384xf32> to vector<8x384xf32>
      %64 = arith.addf %61, %63 : vector<8x384xf32>
      %c0_26 = arith.constant 0 : index
      %c0_27 = arith.constant 0 : index
      %65 = vector.load %arg11[%c0_26, %c0_27] : memref<8x768xf32, #tpu.memory_space<vmem>>, vector<8x384xf32>
      tpu.vector_store %arg11[%c0_26, %c0_27], %64 {strides = array<i32>} : memref<8x768xf32, #tpu.memory_space<vmem>>, vector<8x384xf32>,
      %c0_28 = arith.constant 0 : index
      %c128 = arith.constant 128 : index
      %66 = vector.load %arg2[%c0_28, %c128] : memref<8x512xf32, #tpu.memory_space<vmem>>, vector<8x384xf32>
      %c0_29 = arith.constant 0 : index
      %c384 = arith.constant 384 : index
      %67 = vector.load %arg11[%c0_29, %c384] : memref<8x768xf32, #tpu.memory_space<vmem>>, vector<8x384xf32>
      tpu.vector_store %arg11[%c0_29, %c384], %66 {strides = array<i32>} : memref<8x768xf32, #tpu.memory_space<vmem>>, vector<8x384xf32>,
      %c8_i32_30 = arith.constant 8 : i32
      %68 = arith.muli %arg0, %c8_i32_30 : i32
      %69 = tpu.assume_multiple %68, 8 : i32
      %70 = arith.index_cast %69 : i32 to index
      %c0_31 = arith.constant 0 : index
      %71 = vector.load %arg2[%70, %c0_31] : memref<8x512xf32, #tpu.memory_space<vmem>>, vector<8x512xf32>
      %c0_32 = arith.constant 0 : index
      %c0_33 = arith.constant 0 : index
      %72 = vector.load %arg10[%c0_32, %c0_33] : memref<8x512xf32, #tpu.memory_space<vmem>>, vector<8x512xf32>
      tpu.vector_store %arg10[%c0_32, %c0_33], %71 {strides = array<i32>} : memref<8x512xf32, #tpu.memory_space<vmem>>, vector<8x512xf32>,
    } else {
    }
    %3 = tpu.iota {dimensions = array<i32: 1>} : vector<256x8xi32>
    %c0 = arith.constant 0 : index
    %c0_1 = arith.constant 0 : index
    %4 = vector.load %arg5[%c0, %c0_1] : memref<256x1xi32, #tpu.memory_space<vmem>>, vector<256x1xi32>
    %5 = vector.broadcast %4 : vector<256x1xi32> to vector<256x8xi32>
    %6 = arith.cmpi eq, %3, %5 : vector<256x8xi32>
    %7 = arith.extui %6 : vector<256x8xi1> to vector<256x8xi32>
    %8 = arith.sitofp %7 : vector<256x8xi32> to vector<256x8xf32>
    %9 = tpu.iota {dimensions = array<i32: 0>} : vector<8x256xi32>
    %c8_i32 = arith.constant 8 : i32
    %10 = arith.muli %arg0, %c8_i32 : i32
    %11 = vector.broadcast %10 : i32 to vector<8x256xi32>
    %12 = arith.addi %9, %11 : vector<8x256xi32>
    %c0_2 = arith.constant 0 : index
    %c0_3 = arith.constant 0 : index
    %13 = vector.load %arg4[%c0_2, %c0_3] : memref<1x256xi32, #tpu.memory_space<vmem>>, vector<1x256xi32>
    %14 = vector.broadcast %13 : vector<1x256xi32> to vector<8x256xi32>
    %15 = arith.cmpi eq, %12, %14 : vector<8x256xi32>
    %16 = arith.extui %15 : vector<8x256xi1> to vector<8x256xi32>
    %17 = arith.sitofp %16 : vector<8x256xi32> to vector<8x256xf32>
    %c0_4 = arith.constant 0 : index
    %c0_5 = arith.constant 0 : index
    %18 = vector.load %arg11[%c0_4, %c0_5] : memref<8x768xf32, #tpu.memory_space<vmem>>, vector<8x768xf32>
    %cst = arith.constant dense<0.000000e+00> : vector<256x768xf32>
    %19 = tpu.matmul %8, %18, %cst {dimension_numbers = #tpu.dot_dimension_numbers<[1], [0], [0], [1], [0, 0, 1, 1], [], []>} : vector<256x8xf32>, vector<8x768xf32>, vector<256x768xf32> -> vector<256x768xf32>
    %20 = vector.extract_strided_slice %19 {offsets = [0, 0], sizes = [256, 128], strides = [1, 1]} : vector<256x768xf32> to vector<256x128xf32>
    %21 = vector.extract_strided_slice %19 {offsets = [0, 128], sizes = [256, 128], strides = [1, 1]} : vector<256x768xf32> to vector<256x128xf32>
    %22 = vector.extract_strided_slice %19 {offsets = [0, 256], sizes = [256, 128], strides = [1, 1]} : vector<256x768xf32> to vector<256x128xf32>
    %c0_6 = arith.constant 0 : index
    %c0_7 = arith.constant 0 : index
    %23 = vector.load %arg3[%c0_6, %c0_7] : memref<256x640xf32, #tpu.memory_space<vmem>>, vector<256x640xf32>
    %24 = vector.extract_strided_slice %23 {offsets = [0, 0], sizes = [256, 128], strides = [1, 1]} : vector<256x640xf32> to vector<256x128xf32>
    %25 = arith.mulf %24, %20 : vector<256x128xf32>
    %26 = vector.extract_strided_slice %23 {offsets = [0, 512], sizes = [256, 128], strides = [1, 1]} : vector<256x640xf32> to vector<256x128xf32>
    %27 = arith.mulf %26, %22 : vector<256x128xf32>
    %28 = vector.extract_strided_slice %23 {offsets = [0, 128], sizes = [256, 128], strides = [1, 1]} : vector<256x640xf32> to vector<256x128xf32>
    %29 = arith.mulf %28, %21 : vector<256x128xf32>
    %30 = vector.extract_strided_slice %19 {offsets = [0, 384], sizes = [256, 128], strides = [1, 1]} : vector<256x768xf32> to vector<256x128xf32>
    %31 = arith.mulf %27, %30 : vector<256x128xf32>
    %32 = arith.addf %29, %31 : vector<256x128xf32>
    %33 = vector.extract_strided_slice %23 {offsets = [0, 256], sizes = [256, 128], strides = [1, 1]} : vector<256x640xf32> to vector<256x128xf32>
    %34 = arith.mulf %33, %21 : vector<256x128xf32>
    %35 = vector.extract_strided_slice %19 {offsets = [0, 512], sizes = [256, 128], strides = [1, 1]} : vector<256x768xf32> to vector<256x128xf32>
    %36 = arith.mulf %27, %35 : vector<256x128xf32>
    %37 = arith.addf %34, %36 : vector<256x128xf32>
    %38 = vector.extract_strided_slice %23 {offsets = [0, 384], sizes = [256, 128], strides = [1, 1]} : vector<256x640xf32> to vector<256x128xf32>
    %39 = arith.mulf %38, %21 : vector<256x128xf32>
    %40 = vector.extract_strided_slice %19 {offsets = [0, 640], sizes = [256, 128], strides = [1, 1]} : vector<256x768xf32> to vector<256x128xf32>
    %41 = arith.mulf %27, %40 : vector<256x128xf32>
    %42 = arith.addf %39, %41 : vector<256x128xf32>
    %43 = tpu.concatenate %25, %32, %37, %42 in 1 : vector<256x128xf32>, vector<256x128xf32>, vector<256x128xf32>, vector<256x128xf32> -> vector<256x512xf32>
    %c0_8 = arith.constant 0 : index
    %c0_9 = arith.constant 0 : index
    %44 = vector.load %arg10[%c0_8, %c0_9] : memref<8x512xf32, #tpu.memory_space<vmem>>, vector<8x512xf32>
    %cst_10 = arith.constant dense<0.000000e+00> : vector<8x512xf32>
    %45 = tpu.matmul %17, %43, %cst_10 {dimension_numbers = #tpu.dot_dimension_numbers<[1], [0], [0], [1], [0, 0, 1, 1], [], []>} : vector<8x256xf32>, vector<256x512xf32>, vector<8x512xf32> -> vector<8x512xf32>
    %46 = arith.addf %44, %45 : vector<8x512xf32>
    %c0_11 = arith.constant 0 : index
    %c0_12 = arith.constant 0 : index
    %47 = vector.load %arg10[%c0_11, %c0_12] : memref<8x512xf32, #tpu.memory_space<vmem>>, vector<8x512xf32>
    tpu.vector_store %arg10[%c0_11, %c0_12], %46 {strides = array<i32>} : memref<8x512xf32, #tpu.memory_space<vmem>>, vector<8x512xf32>,
    return
  }
  func.func @transform_0(%arg0: i32, %arg1: i32) -> (i32, i32) {
    %c0_i32 = arith.constant 0 : i32
    %c0_i32_0 = arith.constant 0 : i32
    %c0_i32_1 = arith.constant 0 : i32
    return %c0_i32, %c0_i32_0 : i32, i32
  }
  func.func @transform_1(%arg0: i32, %arg1: i32) -> (i32, i32) {
    %c0_i32 = arith.constant 0 : i32
    %c0_i32_0 = arith.constant 0 : i32
    return %arg1, %c0_i32 : i32, i32
  }
  func.func @transform_2(%arg0: i32, %arg1: i32) -> (i32, i32) {
    %c0_i32 = arith.constant 0 : i32
    %c0_i32_0 = arith.constant 0 : i32
    return %c0_i32, %arg1 : i32, i32
  }
  func.func @transform_3(%arg0: i32, %arg1: i32) -> (i32, i32) {
    %c0_i32 = arith.constant 0 : i32
    %c0_i32_0 = arith.constant 0 : i32
    return %arg1, %c0_i32 : i32, i32
  }
  func.func @transform_4(%arg0: i32, %arg1: i32) -> (i32, i32) {
    %c0_i32 = arith.constant 0 : i32
    %c0_i32_0 = arith.constant 0 : i32
    %c0_i32_1 = arith.constant 0 : i32
    return %c0_i32, %c0_i32_0 : i32, i32
  }
  func.func @transform_5(%arg0: i32, %arg1: i32) -> (i32, i32) {
    %c0_i32 = arith.constant 0 : i32
    %c0_i32_0 = arith.constant 0 : i32
    %c0_i32_1 = arith.constant 0 : i32
    return %c0_i32, %c0_i32_0 : i32, i32
  }
  func.func @transform_6(%arg0: i32, %arg1: i32) -> (i32, i32) {
    %c0_i32 = arith.constant 0 : i32
    %c0_i32_0 = arith.constant 0 : i32
    %c0_i32_1 = arith.constant 0 : i32
    return %c0_i32, %c0_i32_0 : i32, i32
  }
  func.func @transform_7(%arg0: i32, %arg1: i32) -> (i32, i32) {
    %c0_i32 = arith.constant 0 : i32
    %c0_i32_0 = arith.constant 0 : i32
    %c0_i32_1 = arith.constant 0 : i32
    return %c0_i32, %c0_i32_0 : i32, i32
  }
  func.func @transform_8(%arg0: i32, %arg1: i32) -> (i32, i32) {
    %c0_i32 = arith.constant 0 : i32
    %c0_i32_0 = arith.constant 0 : i32
    return %arg0, %c0_i32 : i32, i32
  }
}

</mosaic_0001>

<bundles_post_ra>
// kernel: painn_interaction.1
= control target key start
LH: loop header
LB: loop body
LE: loop exit
PB: predicated region body
PF: predicated region fallthrough
CT: control target
= control target key end

     0   :  { %v2407_v0 = vmov 0.0   ;;  %vm2408_vm0 = vmmov 0   ;;  %vm615_vm3 = vcmask 64512   ;;  %s4457_s4 = inlined_call_operand.vmem [shape: f32[128,128], index: 4, kind: input, shape index: {}]   ;;  %s4458_s0 = inlined_call_operand.vmem [shape: f32[8,512], index: 0, kind: input, shape index: {}]   ;;  %s4459_s6 = inlined_call_operand.vmem [shape: f32[128,384], index: 6, kind: input, shape index: {}]   ;;  %s4460_s3 = inlined_call_operand.vmem [shape: s32[256,1], index: 3, kind: input, shape index: {}]   ;;  %s4461_s5 = inlined_call_operand.vmem [shape: f32[1,128], index: 5, kind: input, shape index: {}]   ;;  %s4462_s7 = inlined_call_operand.vmem [shape: f32[1,384], index: 7, kind: input, shape index: {}]   ;;  %s4463_s1 = inlined_call_operand.vmem [shape: f32[256,640], index: 1, kind: input, shape index: {}]   ;;  %s4464_s2 = inlined_call_operand.vmem [shape: s32[1,256], index: 2, kind: input, shape index: {}]   ;;  %s4465_s8 = inlined_call_operand.vmem [shape: f32[8,512], index: 8, kind: output, shape index: {}]  }
   0x1   :  { %2325 = vmatprep.subr.mxu0 %v2407_v0  ;;  %v49_v1 = vld [vmem:[%s4457_s4 + $0x78] sm:$0xff]  ;;  %v48_v2 = vld [vmem:[%s4457_s4 + $0x70] sm:$0xff]  ;;  %2357 = vmatprep.mubr.msk.f32.mxu0 %vm2408_vm0, %v2407_v0  ;;  %v47_v3 = vld [vmem:[%s4457_s4 + $0x68] sm:$0xff] }
   0x2   :  { %2326 = vmatpush3.msra.mxu0 %v49_v1  ;;  %263 = vmatprep.mubr.f32.mxu1 %v2407_v0  ;;  %v46_v4 = vld [vmem:[%s4457_s4 + $0x60] sm:$0xff]  ;;  %v45_v5 = vld [vmem:[%s4457_s4 + $0x58] sm:$0xff]  ;;  %v44_v6 = vld [vmem:[%s4457_s4 + $0x50] sm:$0xff] }
   0x3   :  { %2327 = vmatprep.subr.mxu0 %v2407_v0  ;;  %v43_v7 = vld [vmem:[%s4457_s4 + $0x48] sm:$0xff]  ;;  %v42_v8 = vld [vmem:[%s4457_s4 + $0x40] sm:$0xff]  ;;  %v41_v9 = vld [vmem:[%s4457_s4 + $0x38] sm:$0xff] }
   0x4   :  { %2328 = vmatpush3.msra.mxu0 %v48_v2  ;;  %v40_v10 = vld [vmem:[%s4457_s4 + $0x30] sm:$0xff]  ;;  %v39_v11 = vld [vmem:[%s4457_s4 + $0x28] sm:$0xff]  ;;  %v38_v12 = vld [vmem:[%s4457_s4 + $0x20] sm:$0xff] }
   0x5   :  { %2329 = vmatprep.subr.mxu0 %v2407_v0  ;;  %v37_v13 = vld [vmem:[%s4457_s4 + $0x18] sm:$0xff]  ;;  %v36_v14 = vld [vmem:[%s4457_s4 + $0x10] sm:$0xff]  ;;  %v35_v15 = vld [vmem:[%s4457_s4 + $0x8] sm:$0xff] }
   0x6   :  { %2330 = vmatpush3.msra.mxu0 %v47_v3  ;;  %v34_v16 = vld [vmem:[%s4457_s4] sm:$0xff]  ;;  %v180_v18 = vld [vmem:[%s4459_s6 + $0x170] sm:$0xff]  ;;  %v179_v19 = vld [vmem:[%s4459_s6 + $0x168] sm:$0xff]  ;;  %v2409_v3 = vmov 0  }
   0x7   :  { %2331 = vmatprep.subr.mxu0 %v2407_v0  ;;  %v33_v17 = vld [vmem:[%s4458_s0] sm:$0xff]  ;;  %199 = vmatprep.subr.mxu1 %v180_v18  ;;  %v181_v20 = vld [vmem:[%s4459_s6 + $0x178] sm:$0xff]  ;;  %v176_v22 = vld [vmem:[%s4459_s6 + $0x150] sm:$0xff] }
   0x8   :  { %2332 = vmatpush3.msra.mxu0 %v46_v4  ;;  %200 = vmatpush1.msra.mxu1 %v179_v19  ;;  %v177_v21 = vld [vmem:[%s4459_s6 + $0x158] sm:$0xff]  ;;  %v178_v23 = vld [vmem:[%s4459_s6 + $0x160] sm:$0xff]  ;;  %v175_v26 = vld [vmem:[%s4459_s6 + $0x148] sm:$0xff] }
   0x9   :  { %2333 = vmatprep.subr.mxu0 %v2407_v0  ;;  %201 = vmatprep.subr.mxu1 %v177_v21  ;;  %v174_v24 = vld [vmem:[%s4459_s6 + $0x140] sm:$0xff]  ;;  %v173_v25 = vld [vmem:[%s4459_s6 + $0x138] sm:$0xff]  ;;  %v171_v27 = vld [vmem:[%s4459_s6 + $0x128] sm:$0xff] }
   0xa   :  { %2334 = vmatpush3.msra.mxu0 %v45_v5  ;;  %202 = vmatpush1.msra.mxu1 %v176_v22  ;;  %v170_v28 = vld [vmem:[%s4459_s6 + $0x120] sm:$0xff]  ;;  %v172_v29 = vld [vmem:[%s4459_s6 + $0x130] sm:$0xff]  ;;  %v167_v31 = vld [vmem:[%s4459_s6 + $0x108] sm:$0xff] }
   0xb   :  { %2335 = vmatprep.subr.mxu0 %v2407_v0  ;;  %203 = vmatprep.subr.mxu1 %v174_v24  ;;  %v168_v30 = vld [vmem:[%s4459_s6 + $0x110] sm:$0xff]  ;;  %v169_v32 = vld [vmem:[%s4459_s6 + $0x118] sm:$0xff]  ;;  %v166_v35 = vld [vmem:[%s4459_s6 + $0x100] sm:$0xff] }
   0xc   :  { %2336 = vmatpush3.msra.mxu0 %v44_v6  ;;  %204 = vmatpush1.msra.mxu1 %v173_v25  ;;  %v165_v33 = vld [vmem:[%s4459_s6 + $0xf8] sm:$0xff]  ;;  %v164_v34 = vld [vmem:[%s4459_s6 + $0xf0] sm:$0xff]  ;;  %v162_v36 = vld [vmem:[%s4459_s6 + $0xe0] sm:$0xff] }
   0xd   :  { %2337 = vmatprep.subr.mxu0 %v2407_v0  ;;  %205 = vmatprep.subr.mxu1 %v171_v27  ;;  %v161_v37 = vld [vmem:[%s4459_s6 + $0xd8] sm:$0xff]  ;;  %v163_v38 = vld [vmem:[%s4459_s6 + $0xe8] sm:$0xff]  ;;  %v158_v40 = vld [vmem:[%s4459_s6 + $0xc0] sm:$0xff] }
   0xe   :  { %2338 = vmatpush3.msra.mxu0 %v43_v7  ;;  %206 = vmatpush1.msra.mxu1 %v170_v28  ;;  %v159_v39 = vld [vmem:[%s4459_s6 + $0xc8] sm:$0xff]  ;;  %v160_v41 = vld [vmem:[%s4459_s6 + $0xd0] sm:$0xff]  ;;  %v157_v44 = vld [vmem:[%s4459_s6 + $0xb8] sm:$0xff] }
   0xf   :  { %2339 = vmatprep.subr.mxu0 %v2407_v0  ;;  %207 = vmatprep.subr.mxu1 %v168_v30  ;;  %v156_v42 = vld [vmem:[%s4459_s6 + $0xb0] sm:$0xff]  ;;  %v155_v43 = vld [vmem:[%s4459_s6 + $0xa8] sm:$0xff]  ;;  %v153_v45 = vld [vmem:[%s4459_s6 + $0x98] sm:$0xff] }
  0x10   :  { %2340 = vmatpush3.msra.mxu0 %v42_v8  ;;  %208 = vmatpush1.msra.mxu1 %v167_v31  ;;  %v152_v46 = vld [vmem:[%s4459_s6 + $0x90] sm:$0xff]  ;;  %v154_v47 = vld [vmem:[%s4459_s6 + $0xa0] sm:$0xff]  ;;  %v149_v49 = vld [vmem:[%s4459_s6 + $0x78] sm:$0xff] }
  0x11   :  { %2341 = vmatprep.subr.mxu0 %v2407_v0  ;;  %209 = vmatprep.subr.mxu1 %v165_v33  ;;  %v150_v48 = vld [vmem:[%s4459_s6 + $0x80] sm:$0xff]  ;;  %v151_v50 = vld [vmem:[%s4459_s6 + $0x88] sm:$0xff]  ;;  %v148_v53 = vld [vmem:[%s4459_s6 + $0x70] sm:$0xff] }
  0x12   :  { %2342 = vmatpush3.msra.mxu0 %v41_v9  ;;  %210 = vmatpush1.msra.mxu1 %v164_v34  ;;  %v147_v51 = vld [vmem:[%s4459_s6 + $0x68] sm:$0xff]  ;;  %v146_v52 = vld [vmem:[%s4459_s6 + $0x60] sm:$0xff]  ;;  %v144_v54 = vld [vmem:[%s4459_s6 + $0x50] sm:$0xff] }
  0x13   :  { %2343 = vmatprep.subr.mxu0 %v2407_v0  ;;  %211 = vmatprep.subr.mxu1 %v162_v36  ;;  %v143_v55 = vld [vmem:[%s4459_s6 + $0x48] sm:$0xff]  ;;  %v145_v56 = vld [vmem:[%s4459_s6 + $0x58] sm:$0xff]  ;;  %v140_v58 = vld [vmem:[%s4459_s6 + $0x30] sm:$0xff] }
  0x14   :  { %2344 = vmatpush3.msra.mxu0 %v40_v10  ;;  %212 = vmatpush1.msra.mxu1 %v161_v37  ;;  %v141_v57 = vld [vmem:[%s4459_s6 + $0x38] sm:$0xff]  ;;  %v142_v59 = vld [vmem:[%s4459_s6 + $0x40] sm:$0xff]  ;;  %v139_v62 = vld [vmem:[%s4459_s6 + $0x28] sm:$0xff] }
  0x15   :  { %2345 = vmatprep.subr.mxu0 %v2407_v0  ;;  %213 = vmatprep.subr.mxu1 %v159_v39  ;;  %v138_v60 = vld [vmem:[%s4459_s6 + $0x20] sm:$0xff]  ;;  %v137_v61 = vld [vmem:[%s4459_s6 + $0x18] sm:$0xff]  ;;  %v135_v63 = vld [vmem:[%s4459_s6 + $0x8] sm:$0xff] }
  0x16   :  { %2346 = vmatpush3.msra.mxu0 %v39_v11  ;;  %214 = vmatpush1.msra.mxu1 %v158_v40  ;;  %v134_v1 = vld [vmem:[%s4459_s6] sm:$0xff]  ;;  %v136_v2 = vld [vmem:[%s4459_s6 + $0x10] sm:$0xff]  ;;  %v368_v4 = vld [vmem:[%s4460_s3 + $0x18] sm:$0xff] }
  0x17   :  { %2347 = vmatprep.subr.mxu0 %v2407_v0  ;;  %215 = vmatprep.subr.mxu1 %v156_v42  ;;  %v370_v5 = vld [vmem:[%s4460_s3 + $0x28] sm:$0xff]  ;;  %v369_v6 = vld [vmem:[%s4460_s3 + $0x20] sm:$0xff]  ;;  %v371_v7 = vld [vmem:[%s4460_s3 + $0x30] sm:$0xff] }
  0x18   :  { %2348 = vmatpush3.msra.mxu0 %v38_v12  ;;  %216 = vmatpush1.msra.mxu1 %v155_v43  ;;  %v372_v8 = vld [vmem:[%s4460_s3 + $0x38] sm:$0xff]  ;;  %v373_v9 = vld [vmem:[%s4460_s3 + $0x40] sm:$0xff]  ;;  %v374_v10 = vld [vmem:[%s4460_s3 + $0x48] sm:$0xff] }
  0x19   :  { %2349 = vmatprep.subr.mxu0 %v2407_v0  ;;  %217 = vmatprep.subr.mxu1 %v153_v45  ;;  %v375_v11 = vld [vmem:[%s4460_s3 + $0x50] sm:$0xff]  ;;  %v376_v12 = vld [vmem:[%s4460_s3 + $0x58] sm:$0xff]  ;;  %v382_v21 = vld [vmem:[%s4460_s3 + $0x88] sm:$0xff] }
  0x1a   :  { %2350 = vmatpush3.msra.mxu0 %v37_v13  ;;  %218 = vmatpush1.msra.mxu1 %v152_v46  ;;  %v377_v13 = vld [vmem:[%s4460_s3 + $0x60] sm:$0xff]  ;;  %v367_v18 = vld [vmem:[%s4460_s3 + $0x10] sm:$0xff]  ;;  %v380_v19 = vld [vmem:[%s4460_s3 + $0x78] sm:$0xff] }
  0x1b   :  { %2351 = vmatprep.subr.mxu0 %v2407_v0  ;;  %219 = vmatprep.subr.mxu1 %v150_v48  ;;  %v383_v22 = vld [vmem:[%s4460_s3 + $0x90] sm:$0xff]  ;;  %v385_v24 = vld [vmem:[%s4460_s3 + $0xa0] sm:$0xff]  ;;  %v386_v25 = vld [vmem:[%s4460_s3 + $0xa8] sm:$0xff] }
  0x1c   :  { %2352 = vmatpush3.msra.mxu0 %v36_v14  ;;  %220 = vmatpush1.msra.mxu1 %v149_v49  ;;  %v365_v14 = vld [vmem:[%s4460_s3] sm:$0xff]  ;;  %v388_v27 = vld [vmem:[%s4460_s3 + $0xb8] sm:$0xff]  ;;  %v391_v30 = vld [vmem:[%s4460_s3 + $0xd0] sm:$0xff]  ;;  %v184_v49 = vlaneseq }
  0x1d   :  { %2353 = vmatprep.subr.mxu0 %v2407_v0  ;;  %221 = vmatprep.subr.mxu1 %v147_v51  ;;  %v389_v28 = vld [vmem:[%s4460_s3 + $0xc0] sm:$0xff]  ;;  %v392_v31 = vld [vmem:[%s4460_s3 + $0xd8] sm:$0xff]  ;;  %v394_v33 = vld [vmem:[%s4460_s3 + $0xe8] sm:$0xff] }
  0x1e   :  { %2354 = vmatpush3.msra.mxu0 %v35_v15  ;;  %222 = vmatpush1.msra.mxu1 %v146_v52  ;;  %v378_v15 = vld [vmem:[%s4460_s3 + $0x68] sm:$0xff]  ;;  %v395_v34 = vld [vmem:[%s4460_s3 + $0xf0] sm:$0xff]  ;;  %v2155_v36 = vld [vmem:[%s4461_s5] ss:$0 sm:$0xff]  ;;  %v2795_v51 = vshrl.u32 %v184_v49, 7 }
  0x1f   :  { %2355 = vmatprep.subr.mxu0 %v2407_v0  ;;  %223 = vmatprep.subr.mxu1 %v144_v54  ;;  %v2799_v54 = vand.u32 127, %v184_v49 }
  0x20   :  { %2356 = vmatpush3.msra.mxu0 %v34_v16  ;;  %224 = vmatpush1.msra.mxu1 %v143_v55  ;;  %v366_v16 = vld [vmem:[%s4460_s3 + $0x8] sm:$0xff]  ;;  %4594 = vst [vmem:[#allocation3_spill] sm:$0xff] %v2795_v51  ;;  %v190_v52 = vsub.s32 1, %v2795_v51  ;;  %v182_v55 = vld [vmem:[%s4462_s7] sm:$0x7] }
  0x21   :  { %2358 = vmatmul.mubr.f32.vlgmr.msra.gmra.mxu0 %v33_v17  ;;  %2360 = vmatprep.subr.mxu0 %v2407_v0  ;;  %v379_v17 = vld [vmem:[%s4460_s3 + $0x70] sm:$0xff] }
  0x22   :  { %2392 = vmatprep.mubr.msk.f32.mxu0 %vm2408_vm0, %v2407_v0  ;;  %2361 = vmatpush3.msra.mxu0 %v181_v20  ;;  %v381_v20 = vld [vmem:[%s4460_s3 + $0x80] sm:$0xff] }
  0x23   :  { %2362 = vmatprep.subr.mxu0 %v2407_v0  ;;  %225 = vmatprep.subr.mxu1 %v141_v57  ;;  %v194_v57 = vsub.s32 2, %v2795_v51 }
  0x24   :  { %2363 = vmatpush3.msra.mxu0 %v178_v23  ;;  %226 = vmatpush1.msra.mxu1 %v140_v58  ;;  %v384_v23 = vld [vmem:[%s4460_s3 + $0x98] sm:$0xff]  ;;  %v191_v58 = vrot.slane %v182_v55, %v190_v52 }
  0x25   :  { %2364 = vmatprep.subr.mxu0 %v2407_v0  ;;  %227 = vmatprep.subr.mxu1 %v138_v60 }
  0x26   :  { %2365 = vmatpush3.msra.mxu0 %v175_v26  ;;  %228 = vmatpush1.msra.mxu1 %v137_v61  ;;  %v387_v26 = vld [vmem:[%s4460_s3 + $0xb0] sm:$0xff] }
  0x27   :  { %2366 = vmatprep.subr.mxu0 %v2407_v0  ;;  %229 = vmatprep.subr.mxu1 %v135_v63 }
  0x28   :  { %2367 = vmatpush3.msra.mxu0 %v172_v29  ;;  %230 = vmatpush1.msra.mxu1 %v134_v1  ;;  %v390_v29 = vld [vmem:[%s4460_s3 + $0xc8] sm:$0xff]  ;;  %v195_v1 = vrot.slane %v182_v55, %v194_v57 }
  0x29   :  { %2368 = vmatprep.subr.mxu0 %v2407_v0  ;;  %2401 = vset.pattern.permute.xlu0 %v2409_v3 }
  0x2a   :  { %2369 = vmatpush3.msra.mxu0 %v169_v32  ;;  %2402 = vset.pattern.permute.xlu1 %v2409_v3  ;;  %v393_v32 = vld [vmem:[%s4460_s3 + $0xe0] sm:$0xff] }
  0x2b   :  { %2370 = vmatprep.subr.mxu0 %v2407_v0  ;;  %407 = vperm.xlu0 %2401, %v368_v4  }
  0x2c   :  { %2371 = vmatpush3.msra.mxu0 %v166_v35  ;;  %413 = vperm.xlu1 %2402, %v370_v5   ;;  %v396_v35 = vld [vmem:[%s4460_s3 + $0xf8] sm:$0xff] }
  0x2d   :  { %2372 = vmatprep.subr.mxu0 %v2407_v0 }
  0x2e   :  { %2373 = vmatpush3.msra.mxu0 %v163_v38 }
  0x2f   :  { %2374 = vmatprep.subr.mxu0 %v2407_v0  ;;  %410 = vperm.xlu0 %2401, %v369_v6  }
  0x30   :  { %2375 = vmatpush3.msra.mxu0 %v160_v41  ;;  %416 = vperm.xlu1 %2402, %v371_v7   ;;  %v343_v7 = vld [vmem:[%s4458_s0 + $0x8] sm:$0xff] }
  0x31   :  { %2376 = vmatprep.subr.mxu0 %v2407_v0 }
  0x32   :  { %2377 = vmatpush3.msra.mxu0 %v157_v44 }
  0x33   :  { %2378 = vmatprep.subr.mxu0 %v2407_v0  ;;  %419 = vperm.xlu0 %2401, %v372_v8   ;;  %v345_v8 = vld [vmem:[%s4458_s0 + $0x18] sm:$0xff] }
  0x34   :  { %2379 = vmatpush3.msra.mxu0 %v154_v47  ;;  %422 = vperm.xlu1 %2402, %v373_v9  }
  0x35   :  { %2380 = vmatprep.subr.mxu0 %v2407_v0 }
  0x36   :  { %2381 = vmatpush3.msra.mxu0 %v151_v50 }
  0x37   :  { %2382 = vmatprep.subr.mxu0 %v2407_v0  ;;  %425 = vperm.xlu0 %2401, %v374_v10   ;;  %v344_v10 = vld [vmem:[%s4458_s0 + $0x10] sm:$0xff] }
  0x38   :  { %2383 = vmatpush3.msra.mxu0 %v148_v53  ;;  %428 = vperm.xlu1 %2402, %v375_v11   ;;  %v4466_v53 = vsub.s32 0, %v2795_v51 }
  0x39   :  { %2384 = vmatprep.subr.mxu0 %v2407_v0 }
  0x3a   :  { %2385 = vmatpush3.msra.mxu0 %v145_v56 }
  0x3b   :  { %2386 = vmatprep.subr.mxu0 %v2407_v0  ;;  %431 = vperm.xlu0 %2401, %v376_v12  }
  0x3c   :  { %2387 = vmatpush3.msra.mxu0 %v142_v59  ;;  %434 = vperm.xlu1 %2402, %v377_v13   ;;  %v187_v59 = vrot.slane %v182_v55, %v4466_v53 }
  0x3d   :  { %2388 = vmatprep.subr.mxu0 %v2407_v0 }
  0x3e   :  { %2389 = vmatpush3.msra.mxu0 %v139_v62 }
  0x3f   :  { %2390 = vmatprep.subr.mxu0 %v2407_v0  ;;  %398 = vperm.xlu0 %2401, %v365_v14  }
  0x40   :  { %2391 = vmatpush3.msra.mxu0 %v136_v2  ;;  %437 = vperm.xlu1 %2402, %v378_v15  }
  0x43   :  { %401 = vperm.xlu0 %2401, %v366_v16  }
  0x44   :  { %440 = vperm.xlu1 %2402, %v379_v17  }
  0x47   :  { %404 = vperm.xlu0 %2401, %v367_v18  }
  0x48   :  { %443 = vperm.xlu1 %2402, %v380_v19  }
  0x4b   :  { %446 = vperm.xlu0 %2401, %v381_v20  }
  0x4c   :  { %449 = vperm.xlu1 %2402, %v382_v21  }
  0x4f   :  { %452 = vperm.xlu0 %2401, %v383_v22  }
  0x50   :  { %455 = vperm.xlu1 %2402, %v384_v23  }
  0x53   :  { %458 = vperm.xlu0 %2401, %v385_v24  }
  0x54   :  { %461 = vperm.xlu1 %2402, %v386_v25  }
  0x57   :  { %464 = vperm.xlu0 %2401, %v387_v26  }
  0x58   :  { %467 = vperm.xlu1 %2402, %v388_v27  }
  0x5b   :  { %470 = vperm.xlu0 %2401, %v389_v28  }
  0x5c   :  { %473 = vperm.xlu1 %2402, %v390_v29  }
  0x5f   :  { %476 = vperm.xlu0 %2401, %v391_v30  }
  0x60   :  { %479 = vperm.xlu1 %2402, %v392_v31  }
  0x63   :  { %482 = vperm.xlu0 %2401, %v393_v32  }
  0x64   :  { %485 = vperm.xlu1 %2402, %v394_v33  }
  0x67   :  { %488 = vperm.xlu0 %2401, %v395_v34  }
  0x68   :  { %491 = vperm.xlu1 %2402, %v396_v35  }
  0xa6   :  { %v408_v45 = vpop.permute.xlu0 %407 }
  0xa7   :  { %vm496_vm1 = vcmp.eq.s32.totalorder %v2799_v54, %v408_v45  ;;  %v414_v11 = vpop.permute.xlu1 %413 }
  0xa8   :  { %v2812_v3 = vsel %vm496_vm1, 1.0, %v2407_v0  ;;  %vm498_vm6 = vcmp.eq.s32.totalorder %v2799_v54, %v414_v11 }
  0xa9   :  { %v2847_v15 = vsel %vm498_vm6, 1.0, %v2407_v0 }
  0xaa   :  { %v411_v46 = vpop.permute.xlu0 %410 }
  0xab   :  { %vm497_vm4 = vcmp.eq.s32.totalorder %v2799_v54, %v411_v46  ;;  %v417_v16 = vpop.permute.xlu1 %416 }
  0xac   :  { %v2835_v12 = vsel %vm497_vm4, 1.0, %v2407_v0  ;;  %vm499_vm8 = vcmp.eq.s32.totalorder %v2799_v54, %v417_v16 }
  0xad   :  { %v2862_v18 = vsel %vm499_vm8, 1.0, %v2407_v0 }
  0xae   :  { %v2789_v47 = vpop.permute.xlu0 %419 }
  0xaf   :  { %vm500_vm9 = vcmp.eq.s32.totalorder %v2799_v54, %v2789_v47  ;;  %v423_v19 = vpop.permute.xlu1 %422 }
  0xb0   :  { %v2873_v20 = vsel %vm500_vm9, 1.0, %v2407_v0  ;;  %vm501_vm10 = vcmp.eq.s32.totalorder %v2799_v54, %v423_v19  ;;  %v1484_v19 = vld [vmem:[%s4463_s1 + $0x8] sm:$0xff] }
  0xb1   :  { %v2883_v21 = vsel %vm501_vm10, 1.0, %v2407_v0 }
  0xb2   :  { %v2791_v48 = vpop.permute.xlu0 %425 }
  0xb3   :  { %v429_v22 = vpop.permute.xlu1 %428  ;;  %vm502_vm11 = vcmp.eq.s32.totalorder %v2799_v54, %v2791_v48 }
  0xb4   :  { %v2894_v23 = vsel %vm502_vm11, 1.0, %v2407_v0  ;;  %vm503_vm12 = vcmp.eq.s32.totalorder %v2799_v54, %v429_v22 }
  0xb5   :  { %v2904_v25 = vsel %vm503_vm12, 1.0, %v2407_v0 }
  0xb6   :  { %v2793_v50 = vpop.permute.xlu0 %431 }
  0xb7   :  { %v435_v24 = vpop.permute.xlu1 %434  ;;  %vm504_vm13 = vcmp.eq.s32.totalorder %v2799_v54, %v2793_v50 }
  0xb8   :  { %v2915_v26 = vsel %vm504_vm13, 1.0, %v2407_v0  ;;  %vm505_vm14 = vcmp.eq.s32.totalorder %v2799_v54, %v435_v24 }
  0xb9   :  { %v2925_v28 = vsel %vm505_vm14, 1.0, %v2407_v0 }
  0xba   :  { %v399_v56 = vpop.permute.xlu0 %398 }
  0xbb   :  { %vm493_vm2 = vcmp.eq.s32.totalorder %v2799_v54, %v399_v56  ;;  %v438_v27 = vpop.permute.xlu1 %437 }
  0xbc   :  { %v2815_v4 = vsel %vm493_vm2, 1.0, %v2407_v0  ;;  %vm506_vm15 = vcmp.eq.s32.totalorder %v2799_v54, %v438_v27 }
  0xbd   :  { %v2935_v30 = vsel %vm506_vm15, 1.0, %v2407_v0 }
  0xbe   :  { %v402_v5 = vpop.permute.xlu0 %401 }
  0xbf   :  { %vm494_vm5 = vcmp.eq.s32.totalorder %v2799_v54, %v402_v5  ;;  %v441_v29 = vpop.permute.xlu1 %440 }
  0xc0   :  { %v2838_v13 = vsel %vm494_vm5, 1.0, %v2407_v0  ;;  %vm507_vm0 = vcmp.eq.s32.totalorder %v2799_v54, %v441_v29 }
  0xc1   :  { %v2945_v31 = vsel %vm507_vm0, 1.0, %v2407_v0 }
  0xc2   :  { %v405_v14 = vpop.permute.xlu0 %404 }
  0xc3   :  { %vm495_vm7 = vcmp.eq.s32.totalorder %v2799_v54, %v405_v14  ;;  %v444_v32 = vpop.permute.xlu1 %443 }
  0xc4   :  { %v2852_v17 = vsel %vm495_vm7, 1.0, %v2407_v0  ;;  %vm508_vm1 = vcmp.eq.s32.totalorder %v2799_v54, %v444_v32 }
  0xc5   :  { %v2955_v34 = vsel %vm508_vm1, 1.0, %v2407_v0 }
  0xc6   :  { %v447_v33 = vpop.permute.xlu0 %446 }
  0xc7   :  { %vm509_vm2 = vcmp.eq.s32.totalorder %v2799_v54, %v447_v33 }
  0xc8   :  { %v2965_v35 = vsel %vm509_vm2, 1.0, %v2407_v0 }
  0xe1   :  { %v123_v37 = vpop.f32.mrf.mxu0 }
  0xe2   :  { %v124_v38 = vadd.f32 %v2155_v36, %v123_v37  ;;  %v450_v36 = vpop.permute.xlu1 %449  ;;  %v453_v37 = vpop.permute.xlu0 %452 }
  0xe3   :  { %v2359_v39 = vpop.f32.mrf.mxu0  ;;  %vm510_vm4 = vcmp.eq.s32.totalorder %v2799_v54, %v450_v36  ;;  %vm511_vm5 = vcmp.eq.s32.totalorder %v2799_v54, %v453_v37 }
  0xe4   :  { %v2156_v40 = vmul.f32 -1.442695, %v124_v38  ;;  %v2985_v39 = vsel %vm511_vm5, 1.0, %v2407_v0 }
  0xe6   :  { %2403 = vpow2.f32 %v2156_v40  ;;  %v456_v40 = vpop.permute.xlu1 %455 }
  0xe7   :  { %vm512_vm6 = vcmp.eq.s32.totalorder %v2799_v54, %v456_v40 }
  0xf3   :  { %v2404_v41 = vpop.eup %2403 }
  0xf4   :  { %v130_v42 = vadd.f32 1.0, %v2404_v41  ;;  %v459_v41 = vpop.permute.xlu0 %458 }
  0xf5   :  { %vm513_vm7 = vcmp.eq.s32.totalorder %v2799_v54, %v459_v41 }
  0xf6   :  { %2405 = vrcp.f32 %v130_v42  ;;  %v2995_v42 = vsel %vm512_vm6, 1.0, %v2407_v0 }
  0xf8   :  { %v465_v45 = vpop.permute.xlu0 %464 }
  0xf9   :  { %vm515_vm9 = vcmp.eq.s32.totalorder %v2799_v54, %v465_v45  ;;  %v1502_v45 = vld [vmem:[%s4463_s1 + $0x98] sm:$0xff] }
  0xfa   :  { %v3025_v47 = vsel %vm515_vm9, 1.0, %v2407_v0 }
  0xfc   :  { %v471_v49 = vpop.permute.xlu0 %470 }
  0xfd   :  { %vm517_vm11 = vcmp.eq.s32.totalorder %v2799_v54, %v471_v49 }
  0xfe   :  { %v3045_v55 = vsel %vm517_vm11, 1.0, %v2407_v0 }
 0x100   :  { %v477_v57 = vpop.permute.xlu0 %476 }
 0x101   :  { %vm519_vm13 = vcmp.eq.s32.totalorder %v2799_v54, %v477_v57 }
 0x103   :  { %v2406_v43 = vpop.eup %2405 }
 0x104   :  { %v133_v44 = vmul.f32 %v2406_v43, %v124_v38  ;;  %v2975_v38 = vsel %vm510_vm4, 1.0, %v2407_v0  ;;  %v3005_v43 = vsel %vm513_vm7, 1.0, %v2407_v0 }
 0x106   :  { %264 = vmatmul.mubr.f32.vlgmr.msra.gmra.mxu1 %v133_v44  ;;  %2393 = vmatmul.mubr.f32.vlgmr.msra.gmra.mxu0 %v133_v44  ;;  %v462_v44 = vpop.permute.xlu1 %461 }
 0x107   :  { %776 = vmatprep.mubr.f32.mxu0 %v2407_v0  ;;  %794 = vmatprep.mubr.f32.mxu1 %v2407_v0  ;;  %vm514_vm8 = vcmp.eq.s32.totalorder %v2799_v54, %v462_v44 }
 0x108   :  { %v3015_v46 = vsel %vm514_vm8, 1.0, %v2407_v0 }
 0x10a   :  { %v468_v48 = vpop.permute.xlu1 %467 }
 0x10b   :  { %vm516_vm10 = vcmp.eq.s32.totalorder %v2799_v54, %v468_v48 }
 0x10c   :  { %v3035_v50 = vsel %vm516_vm10, 1.0, %v2407_v0 }
 0x10e   :  { %v474_v56 = vpop.permute.xlu1 %473 }
 0x10f   :  { %vm518_vm12 = vcmp.eq.s32.totalorder %v2799_v54, %v474_v56 }
 0x1c6   :  { %v265_v60 = vpop.f32.mrf.mxu1  ;;  %v336_v61 = vpop.f32.mrf.mxu0 }
 0x1c7   :  { %v266_v6 = vadd.f32 %v265_v60, %v187_v59  ;;  %v337_v9 = vadd.f32 %v336_v61, %v195_v1  ;;  %v3065_v59 = vsel %vm519_vm13, 1.0, %v2407_v0  ;;  %v480_v60 = vpop.permute.xlu1 %479  ;;  %v483_v61 = vpop.permute.xlu0 %482 }
 0x1c8   :  { %v267_v62 = vpop.f32.mrf.mxu1  ;;  %v2394_v63 = vpop.f32.mrf.mxu0  ;;  %vm520_vm14 = vcmp.eq.s32.totalorder %v2799_v54, %v480_v60  ;;  %vm521_vm15 = vcmp.eq.s32.totalorder %v2799_v54, %v483_v61  ;;  %v1507_v61 = vld [vmem:[%s4463_s1 + $0xc0] sm:$0xff] }
 0x1c9   :  { %v268_v2 = vadd.f32 %v267_v62, %v191_v58  ;;  %v3055_v58 = vsel %vm518_vm12, 1.0, %v2407_v0  ;;  %v3075_v62 = vsel %vm520_vm14, 1.0, %v2407_v0  ;;  %v3085_v63 = vsel %vm521_vm15, 1.0, %v2407_v0 }
 0x1cb   :  { %742 = vmatprep.subr.mxu0 %v268_v2  ;;  %2395 = vmatprep.subr.mxu1 %v268_v2  ;;  %v486_v1 = vpop.permute.xlu1 %485  ;;  %v489_v2 = vpop.permute.xlu0 %488 }
 0x1cc   :  { %743 = vmatpush1.msra.mxu0 %v266_v6  ;;  %2396 = vmatpush1.msra.mxu1 %v266_v6  ;;  %vm522_vm0 = vcmp.eq.s32.totalorder %v2799_v54, %v486_v1  ;;  %vm523_vm1 = vcmp.eq.s32.totalorder %v2799_v54, %v489_v2 }
 0x1cd   :  { %2191 = vmatmul.mubr.msk.f32.vlgmr.msra.gmra.mxu0 %vm615_vm3, %v2815_v4  ;;  %2194 = vmatmul.mubr.msk.f32.vlgmr.msra.gmra.mxu1 %vm615_vm3, %v2812_v3  ;;  %v3095_v5 = vsel %vm522_vm0, 1.0, %v2407_v0 }
 0x1ce   :  { %999 = vmatprep.subr.mxu0 %v343_v7  ;;  %1256 = vmatprep.subr.mxu1 %v345_v8  ;;  %v3105_v7 = vsel %vm523_vm1, 1.0, %v2407_v0 }
 0x1cf   :  { %1000 = vmatpush1.msra.mxu0 %v337_v9  ;;  %782 = vmatprep.mubr.f32.mxu0 %v2407_v0  ;;  %v492_v6 = vpop.permute.xlu1 %491 }
 0x1d0   :  { %800 = vmatprep.mubr.f32.mxu1 %v2407_v0  ;;  %1257 = vmatpush1.msra.mxu1 %v344_v10  ;;  %vm524_vm2 = vcmp.eq.s32.totalorder %v2799_v54, %v492_v6 }
 0x1d1   :  { %2192 = vmatmul.mubr.msk.f32.gmra.mxu0 %vm615_vm3, %v2838_v13  ;;  %2195 = vmatmul.mubr.msk.f32.gmra.mxu1 %vm615_vm3, %v2835_v12  ;;  %v3115_v8 = vsel %vm524_vm2, 1.0, %v2407_v0 }
 0x1d2   :  { %788 = vmatprep.mubr.f32.mxu0 %v2407_v0  ;;  %806 = vmatprep.mubr.f32.mxu1 %v2407_v0 }
 0x1d5   :  { %2193 = vmatmul.mubr.msk.f32.gmra.mxu0 %vm615_vm3, %v2852_v17  ;;  %2196 = vmatmul.mubr.msk.f32.gmra.mxu1 %vm615_vm3, %v2847_v15 }
 0x1d6   :  { %812 = vmatprep.mubr.f32.mxu1 %v2407_v0  ;;  %1033 = vmatprep.mubr.f32.mxu0 %v2407_v0 }
 0x1d9   :  { %2197 = vmatmul.mubr.msk.f32.gmra.mxu1 %vm615_vm3, %v2862_v18  ;;  %2223 = vmatmul.mubr.msk.f32.vlgmr.msra.gmra.mxu0 %vm615_vm3, %v2815_v4 }
 0x1da   :  { %818 = vmatprep.mubr.f32.mxu1 %v2407_v0  ;;  %1039 = vmatprep.mubr.f32.mxu0 %v2407_v0 }
 0x1dd   :  { %2198 = vmatmul.mubr.msk.f32.gmra.mxu1 %vm615_vm3, %v2873_v20  ;;  %2224 = vmatmul.mubr.msk.f32.gmra.mxu0 %vm615_vm3, %v2838_v13 }
 0x1de   :  { %824 = vmatprep.mubr.f32.mxu1 %v2407_v0  ;;  %1045 = vmatprep.mubr.f32.mxu0 %v2407_v0 }
 0x1e1   :  { %2199 = vmatmul.mubr.msk.f32.gmra.mxu1 %vm615_vm3, %v2883_v21  ;;  %2225 = vmatmul.mubr.msk.f32.gmra.mxu0 %vm615_vm3, %v2852_v17 }
 0x1e2   :  { %830 = vmatprep.mubr.f32.mxu1 %v2407_v0  ;;  %1051 = vmatprep.mubr.f32.mxu0 %v2407_v0 }
 0x1e5   :  { %2200 = vmatmul.mubr.msk.f32.gmra.mxu1 %vm615_vm3, %v2894_v23  ;;  %2226 = vmatmul.mubr.msk.f32.gmra.mxu0 %vm615_vm3, %v2812_v3 }
 0x1e6   :  { %836 = vmatprep.mubr.f32.mxu1 %v2407_v0  ;;  %1057 = vmatprep.mubr.f32.mxu0 %v2407_v0 }
 0x1e9   :  { %2201 = vmatmul.mubr.msk.f32.gmra.mxu1 %vm615_vm3, %v2904_v25  ;;  %2227 = vmatmul.mubr.msk.f32.gmra.mxu0 %vm615_vm3, %v2835_v12 }
 0x1ea   :  { %842 = vmatprep.mubr.f32.mxu1 %v2407_v0  ;;  %1063 = vmatprep.mubr.f32.mxu0 %v2407_v0 }
 0x1ed   :  { %2202 = vmatmul.mubr.msk.f32.gmra.mxu1 %vm615_vm3, %v2915_v26  ;;  %2228 = vmatmul.mubr.msk.f32.gmra.mxu0 %vm615_vm3, %v2847_v15 }
 0x1ee   :  { %848 = vmatprep.mubr.f32.mxu1 %v2407_v0  ;;  %1069 = vmatprep.mubr.f32.mxu0 %v2407_v0 }
 0x1f1   :  { %2203 = vmatmul.mubr.msk.f32.gmra.mxu1 %vm615_vm3, %v2925_v28  ;;  %2229 = vmatmul.mubr.msk.f32.gmra.mxu0 %vm615_vm3, %v2862_v18 }
 0x1f2   :  { %854 = vmatprep.mubr.f32.mxu1 %v2407_v0  ;;  %1075 = vmatprep.mubr.f32.mxu0 %v2407_v0 }
 0x1f5   :  { %2204 = vmatmul.mubr.msk.f32.gmra.mxu1 %vm615_vm3, %v2935_v30  ;;  %2230 = vmatmul.mubr.msk.f32.gmra.mxu0 %vm615_vm3, %v2873_v20 }
 0x1f6   :  { %860 = vmatprep.mubr.f32.mxu1 %v2407_v0  ;;  %1081 = vmatprep.mubr.f32.mxu0 %v2407_v0 }
 0x1f9   :  { %2205 = vmatmul.mubr.msk.f32.gmra.mxu1 %vm615_vm3, %v2945_v31  ;;  %2231 = vmatmul.mubr.msk.f32.gmra.mxu0 %vm615_vm3, %v2883_v21 }
 0x1fa   :  { %866 = vmatprep.mubr.f32.mxu1 %v2407_v0  ;;  %1087 = vmatprep.mubr.f32.mxu0 %v2407_v0 }
 0x1fd   :  { %2206 = vmatmul.mubr.msk.f32.gmra.mxu1 %vm615_vm3, %v2955_v34  ;;  %2232 = vmatmul.mubr.msk.f32.gmra.mxu0 %vm615_vm3, %v2894_v23 }
 0x1fe   :  { %872 = vmatprep.mubr.f32.mxu1 %v2407_v0  ;;  %1093 = vmatprep.mubr.f32.mxu0 %v2407_v0 }
 0x201   :  { %2207 = vmatmul.mubr.msk.f32.gmra.mxu1 %vm615_vm3, %v2965_v35  ;;  %2233 = vmatmul.mubr.msk.f32.gmra.mxu0 %vm615_vm3, %v2904_v25 }
 0x202   :  { %878 = vmatprep.mubr.f32.mxu1 %v2407_v0  ;;  %1099 = vmatprep.mubr.f32.mxu0 %v2407_v0 }
 0x205   :  { %2208 = vmatmul.mubr.msk.f32.gmra.mxu1 %vm615_vm3, %v2975_v38  ;;  %2234 = vmatmul.mubr.msk.f32.gmra.mxu0 %vm615_vm3, %v2915_v26 }
 0x206   :  { %884 = vmatprep.mubr.f32.mxu1 %v2407_v0  ;;  %1105 = vmatprep.mubr.f32.mxu0 %v2407_v0 }
 0x209   :  { %2209 = vmatmul.mubr.msk.f32.gmra.mxu1 %vm615_vm3, %v2985_v39  ;;  %2235 = vmatmul.mubr.msk.f32.gmra.mxu0 %vm615_vm3, %v2925_v28 }
 0x20a   :  { %890 = vmatprep.mubr.f32.mxu1 %v2407_v0  ;;  %1111 = vmatprep.mubr.f32.mxu0 %v2407_v0 }
 0x20d   :  { %2210 = vmatmul.mubr.msk.f32.gmra.mxu1 %vm615_vm3, %v2995_v42  ;;  %2236 = vmatmul.mubr.msk.f32.gmra.mxu0 %vm615_vm3, %v2935_v30 }
 0x20e   :  { %896 = vmatprep.mubr.f32.mxu1 %v2407_v0  ;;  %1117 = vmatprep.mubr.f32.mxu0 %v2407_v0 }
 0x211   :  { %2211 = vmatmul.mubr.msk.f32.gmra.mxu1 %vm615_vm3, %v3005_v43  ;;  %2237 = vmatmul.mubr.msk.f32.gmra.mxu0 %vm615_vm3, %v2945_v31 }
 0x212   :  { %902 = vmatprep.mubr.f32.mxu1 %v2407_v0  ;;  %1123 = vmatprep.mubr.f32.mxu0 %v2407_v0 }
 0x215   :  { %2212 = vmatmul.mubr.msk.f32.gmra.mxu1 %vm615_vm3, %v3015_v46  ;;  %2238 = vmatmul.mubr.msk.f32.gmra.mxu0 %vm615_vm3, %v2955_v34 }
 0x216   :  { %908 = vmatprep.mubr.f32.mxu1 %v2407_v0  ;;  %1129 = vmatprep.mubr.f32.mxu0 %v2407_v0 }
 0x219   :  { %2213 = vmatmul.mubr.msk.f32.gmra.mxu1 %vm615_vm3, %v3025_v47  ;;  %2239 = vmatmul.mubr.msk.f32.gmra.mxu0 %vm615_vm3, %v2965_v35 }
 0x21a   :  { %914 = vmatprep.mubr.f32.mxu1 %v2407_v0  ;;  %1135 = vmatprep.mubr.f32.mxu0 %v2407_v0 }
 0x21d   :  { %2214 = vmatmul.mubr.msk.f32.gmra.mxu1 %vm615_vm3, %v3035_v50  ;;  %2240 = vmatmul.mubr.msk.f32.gmra.mxu0 %vm615_vm3, %v2975_v38 }
 0x21e   :  { %920 = vmatprep.mubr.f32.mxu1 %v2407_v0  ;;  %1141 = vmatprep.mubr.f32.mxu0 %v2407_v0 }
 0x221   :  { %2215 = vmatmul.mubr.msk.f32.gmra.mxu1 %vm615_vm3, %v3045_v55  ;;  %2241 = vmatmul.mubr.msk.f32.gmra.mxu0 %vm615_vm3, %v2985_v39 }
 0x222   :  { %926 = vmatprep.mubr.f32.mxu1 %v2407_v0  ;;  %1147 = vmatprep.mubr.f32.mxu0 %v2407_v0 }
 0x225   :  { %2216 = vmatmul.mubr.msk.f32.gmra.mxu1 %vm615_vm3, %v3055_v58  ;;  %2242 = vmatmul.mubr.msk.f32.gmra.mxu0 %vm615_vm3, %v2995_v42 }
 0x226   :  { %932 = vmatprep.mubr.f32.mxu1 %v2407_v0  ;;  %1153 = vmatprep.mubr.f32.mxu0 %v2407_v0 }
 0x229   :  { %2217 = vmatmul.mubr.msk.f32.gmra.mxu1 %vm615_vm3, %v3065_v59  ;;  %2243 = vmatmul.mubr.msk.f32.gmra.mxu0 %vm615_vm3, %v3005_v43 }
 0x22a   :  { %938 = vmatprep.mubr.f32.mxu1 %v2407_v0  ;;  %1159 = vmatprep.mubr.f32.mxu0 %v2407_v0 }
 0x22d   :  { %2218 = vmatmul.mubr.msk.f32.gmra.mxu1 %vm615_vm3, %v3075_v62  ;;  %2244 = vmatmul.mubr.msk.f32.gmra.mxu0 %vm615_vm3, %v3015_v46 }
 0x22e   :  { %944 = vmatprep.mubr.f32.mxu1 %v2407_v0  ;;  %1165 = vmatprep.mubr.f32.mxu0 %v2407_v0 }
 0x231   :  { %2219 = vmatmul.mubr.msk.f32.gmra.mxu1 %vm615_vm3, %v3085_v63  ;;  %2245 = vmatmul.mubr.msk.f32.gmra.mxu0 %vm615_vm3, %v3025_v47 }
 0x232   :  { %950 = vmatprep.mubr.f32.mxu1 %v2407_v0  ;;  %1171 = vmatprep.mubr.f32.mxu0 %v2407_v0 }
 0x235   :  { %2220 = vmatmul.mubr.msk.f32.gmra.mxu1 %vm615_vm3, %v3095_v5  ;;  %2246 = vmatmul.mubr.msk.f32.gmra.mxu0 %vm615_vm3, %v3035_v50 }
 0x236   :  { %956 = vmatprep.mubr.f32.mxu1 %v2407_v0  ;;  %1177 = vmatprep.mubr.f32.mxu0 %v2407_v0 }
 0x239   :  { %2221 = vmatmul.mubr.msk.f32.gmra.mxu1 %vm615_vm3, %v3105_v7  ;;  %2247 = vmatmul.mubr.msk.f32.gmra.mxu0 %vm615_vm3, %v3045_v55 }
 0x23a   :  { %962 = vmatprep.mubr.f32.mxu1 %v2407_v0  ;;  %1183 = vmatprep.mubr.f32.mxu0 %v2407_v0 }
 0x23d   :  { %2222 = vmatmul.mubr.msk.f32.gmra.mxu1 %vm615_vm3, %v3115_v8  ;;  %2248 = vmatmul.mubr.msk.f32.gmra.mxu0 %vm615_vm3, %v3055_v58 }
 0x23e   :  { %1189 = vmatprep.mubr.f32.mxu0 %v2407_v0  ;;  %1290 = vmatprep.mubr.f32.mxu1 %v2407_v0 }
 0x241   :  { %2249 = vmatmul.mubr.msk.f32.gmra.mxu0 %vm615_vm3, %v3065_v59  ;;  %2255 = vmatmul.mubr.msk.f32.vlgmr.msra.gmra.mxu1 %vm615_vm3, %v2815_v4 }
 0x242   :  { %1195 = vmatprep.mubr.f32.mxu0 %v2407_v0  ;;  %1296 = vmatprep.mubr.f32.mxu1 %v2407_v0 }
 0x245   :  { %2250 = vmatmul.mubr.msk.f32.gmra.mxu0 %vm615_vm3, %v3075_v62  ;;  %2256 = vmatmul.mubr.msk.f32.gmra.mxu1 %vm615_vm3, %v2838_v13 }
 0x246   :  { %1201 = vmatprep.mubr.f32.mxu0 %v2407_v0  ;;  %1302 = vmatprep.mubr.f32.mxu1 %v2407_v0 }
 0x249   :  { %2251 = vmatmul.mubr.msk.f32.gmra.mxu0 %vm615_vm3, %v3085_v63  ;;  %2257 = vmatmul.mubr.msk.f32.gmra.mxu1 %vm615_vm3, %v2852_v17 }
 0x24a   :  { %1207 = vmatprep.mubr.f32.mxu0 %v2407_v0  ;;  %1308 = vmatprep.mubr.f32.mxu1 %v2407_v0 }
 0x24d   :  { %2252 = vmatmul.mubr.msk.f32.gmra.mxu0 %vm615_vm3, %v3095_v5  ;;  %2258 = vmatmul.mubr.msk.f32.gmra.mxu1 %vm615_vm3, %v2812_v3 }
 0x24e   :  { %1213 = vmatprep.mubr.f32.mxu0 %v2407_v0  ;;  %1314 = vmatprep.mubr.f32.mxu1 %v2407_v0 }
 0x251   :  { %2253 = vmatmul.mubr.msk.f32.gmra.mxu0 %vm615_vm3, %v3105_v7  ;;  %2259 = vmatmul.mubr.msk.f32.gmra.mxu1 %vm615_vm3, %v2835_v12 }
 0x252   :  { %1219 = vmatprep.mubr.f32.mxu0 %v2407_v0  ;;  %1320 = vmatprep.mubr.f32.mxu1 %v2407_v0 }
 0x255   :  { %2254 = vmatmul.mubr.msk.f32.gmra.mxu0 %vm615_vm3, %v3115_v8  ;;  %2260 = vmatmul.mubr.msk.f32.gmra.mxu1 %vm615_vm3, %v2847_v15 }
 0x256   :  { %1326 = vmatprep.mubr.f32.mxu1 %v2407_v0 }
 0x259   :  { %2261 = vmatmul.mubr.msk.f32.gmra.mxu1 %vm615_vm3, %v2862_v18  ;;  %v1487_v18 = vld [vmem:[%s4463_s1 + $0x20] sm:$0xff] }
 0x25a   :  { %1332 = vmatprep.mubr.f32.mxu1 %v2407_v0 }
 0x25d   :  { %2262 = vmatmul.mubr.msk.f32.gmra.mxu1 %vm615_vm3, %v2873_v20 }
 0x25e   :  { %1338 = vmatprep.mubr.f32.mxu1 %v2407_v0 }
 0x261   :  { %2263 = vmatmul.mubr.msk.f32.gmra.mxu1 %vm615_vm3, %v2883_v21 }
 0x262   :  { %1344 = vmatprep.mubr.f32.mxu1 %v2407_v0 }
 0x265   :  { %2264 = vmatmul.mubr.msk.f32.gmra.mxu1 %vm615_vm3, %v2894_v23 }
 0x266   :  { %1350 = vmatprep.mubr.f32.mxu1 %v2407_v0 }
 0x269   :  { %2265 = vmatmul.mubr.msk.f32.gmra.mxu1 %vm615_vm3, %v2904_v25  ;;  %v1492_v25 = vld [vmem:[%s4463_s1 + $0x48] sm:$0xff] }
 0x26a   :  { %1356 = vmatprep.mubr.f32.mxu1 %v2407_v0 }
 0x26d   :  { %2266 = vmatmul.mubr.msk.f32.gmra.mxu1 %vm615_vm3, %v2915_v26 }
 0x26e   :  { %1362 = vmatprep.mubr.f32.mxu1 %v2407_v0 }
 0x271   :  { %2267 = vmatmul.mubr.msk.f32.gmra.mxu1 %vm615_vm3, %v2925_v28  ;;  %v1489_v28 = vld [vmem:[%s4463_s1 + $0x30] sm:$0xff] }
 0x272   :  { %1368 = vmatprep.mubr.f32.mxu1 %v2407_v0 }
 0x275   :  { %2268 = vmatmul.mubr.msk.f32.gmra.mxu1 %vm615_vm3, %v2935_v30 }
 0x276   :  { %1374 = vmatprep.mubr.f32.mxu1 %v2407_v0 }
 0x279   :  { %2269 = vmatmul.mubr.msk.f32.gmra.mxu1 %vm615_vm3, %v2945_v31 }
 0x27a   :  { %1380 = vmatprep.mubr.f32.mxu1 %v2407_v0 }
 0x27d   :  { %2270 = vmatmul.mubr.msk.f32.gmra.mxu1 %vm615_vm3, %v2955_v34 }
 0x27e   :  { %1386 = vmatprep.mubr.f32.mxu1 %v2407_v0 }
 0x281   :  { %2271 = vmatmul.mubr.msk.f32.gmra.mxu1 %vm615_vm3, %v2965_v35  ;;  %v1497_v35 = vld [vmem:[%s4463_s1 + $0x70] sm:$0xff] }
 0x282   :  { %1392 = vmatprep.mubr.f32.mxu1 %v2407_v0 }
 0x285   :  { %2272 = vmatmul.mubr.msk.f32.gmra.mxu1 %vm615_vm3, %v2975_v38  ;;  %v1494_v38 = vld [vmem:[%s4463_s1 + $0x58] sm:$0xff] }
 0x286   :  { %1398 = vmatprep.mubr.f32.mxu1 %v2407_v0 }
 0x289   :  { %2273 = vmatmul.mubr.msk.f32.gmra.mxu1 %vm615_vm3, %v2985_v39 }
 0x28a   :  { %1404 = vmatprep.mubr.f32.mxu1 %v2407_v0 }
 0x28d   :  { %v3197_v54 = vpop.f32.mrf.mxu0  ;;  %v3199_v3 = vpop.f32.mrf.mxu1  ;;  %2274 = vmatmul.mubr.msk.f32.gmra.mxu1 %vm615_vm3, %v2995_v42 }
 0x28e   :  { %4595 = vst [vmem:[#allocation4_spill] sm:$0xff] %v3197_v54  ;;  %4596 = vst [vmem:[#allocation5_spill] sm:$0xff] %v3199_v3  ;;  %1410 = vmatprep.mubr.f32.mxu1 %v2407_v0  ;;  %v1554_v54 = vld [vmem:[%s4463_s1 + $0x238] sm:$0xff] }
 0x28f   :  { %v3204_v4 = vpop.f32.mrf.mxu0  ;;  %v3206_v9 = vpop.f32.mrf.mxu1 }
 0x290   :  { %4597 = vst [vmem:[#allocation6_spill] sm:$0xff] %v3204_v4  ;;  %4598 = vst [vmem:[#allocation7_spill] sm:$0xff] %v3206_v9  ;;  %v1707_v26 = vmul.f32 %v1484_v19, %v3204_v4 }
 0x291   :  { %v3208_v10 = vpop.f32.mrf.mxu0  ;;  %v3210_v11 = vpop.f32.mrf.mxu1  ;;  %2275 = vmatmul.mubr.msk.f32.gmra.mxu1 %vm615_vm3, %v3005_v43 }
 0x292   :  { %4599 = vst [vmem:[#allocation8_spill] sm:$0xff] %v3208_v10  ;;  %4600 = vst [vmem:[#allocation9_spill] sm:$0xff] %v3210_v11  ;;  %1416 = vmatprep.mubr.f32.mxu1 %v2407_v0 }
 0x293   :  { %v3215_v12 = vpop.f32.mrf.mxu0  ;;  %v3217_v13 = vpop.f32.mrf.mxu1 }
 0x294   :  { %4601 = vst [vmem:[#allocation10_spill] sm:$0xff] %v3215_v12  ;;  %4602 = vst [vmem:[#allocation11_spill] sm:$0xff] %v3217_v13  ;;  %v1708_v36 = vmul.f32 %v1489_v28, %v3215_v12 }
 0x295   :  { %v3219_v14 = vpop.f32.mrf.mxu0  ;;  %v3221_v15 = vpop.f32.mrf.mxu1  ;;  %2276 = vmatmul.mubr.msk.f32.gmra.mxu1 %vm615_vm3, %v3015_v46 }
 0x296   :  { %4603 = vst [vmem:[#allocation12_spill] sm:$0xff] %v3219_v14  ;;  %4604 = vst [vmem:[#allocation13_spill] sm:$0xff] %v3221_v15  ;;  %1422 = vmatprep.mubr.f32.mxu1 %v2407_v0  ;;  %v1549_v14 = vld [vmem:[%s4463_s1 + $0x210] sm:$0xff] }
 0x297   :  { %v3226_v16 = vpop.f32.mrf.mxu0  ;;  %v3228_v17 = vpop.f32.mrf.mxu1 }
 0x298   :  { %4605 = vst [vmem:[#allocation14_spill] sm:$0xff] %v3226_v16  ;;  %4606 = vst [vmem:[#allocation15_spill] sm:$0xff] %v3228_v17  ;;  %v1709_v46 = vmul.f32 %v1494_v38, %v3226_v16 }
 0x299   :  { %v3236_v20 = vpop.f32.mrf.mxu1  ;;  %v1035_v21 = vpop.f32.mrf.mxu0  ;;  %2277 = vmatmul.mubr.msk.f32.gmra.mxu1 %vm615_vm3, %v3025_v47 }
 0x29a   :  { %4607 = vst [vmem:[#allocation16_spill] sm:$0xff] %v3236_v20  ;;  %v3240_v22 = vmul.f32 %v1487_v18, %v1035_v21  ;;  %1428 = vmatprep.mubr.f32.mxu1 %v2407_v0  ;;  %v1504_v18 = vld [vmem:[%s4463_s1 + $0xa8] sm:$0xff] }
 0x29b   :  { %v3243_v23 = vpop.f32.mrf.mxu1  ;;  %v1037_v24 = vpop.f32.mrf.mxu0 }
 0x29c   :  { %4608 = vst [vmem:[#allocation17_spill] sm:$0xff] %v3240_v22  ;;  %v1739_v27 = vmul.f32 %v3240_v22, %v1037_v24  ;;  %v1547_v22 = vld [vmem:[%s4463_s1 + $0x200] sm:$0xff] }
 0x29d   :  { %v3253_v29 = vpop.f32.mrf.mxu1  ;;  %v1041_v30 = vpop.f32.mrf.mxu0  ;;  %2278 = vmatmul.mubr.msk.f32.gmra.mxu1 %vm615_vm3, %v3035_v50  ;;  %v1499_v50 = vld [vmem:[%s4463_s1 + $0x80] sm:$0xff] }
 0x29e   :  { %v3257_v31 = vadd.f32 %v1739_v27, %v1707_v26  ;;  %v3259_v32 = vmul.f32 %v1492_v25, %v1041_v30  ;;  %1434 = vmatprep.mubr.f32.mxu1 %v2407_v0  ;;  %v1710_v1 = vmul.f32 %v1499_v50, %v3206_v9  ;;  %v1711_v26 = vmul.f32 %v1504_v18, %v3217_v13 }
 0x29f   :  { %v3262_v33 = vpop.f32.mrf.mxu1  ;;  %v1043_v34 = vpop.f32.mrf.mxu0 }
 0x2a0   :  { %4609 = vst [vmem:[#allocation18_spill] sm:$0xff] %v3257_v31  ;;  %4610 = vst [vmem:[#allocation19_spill] sm:$0xff] %v3259_v32  ;;  %v1740_v37 = vmul.f32 %v3259_v32, %v1043_v34 }
 0x2a1   :  { %4611 = vst [vmem:[#allocation20_spill] sm:$0xff] %v3262_v33  ;;  %v3272_v39 = vpop.f32.mrf.mxu1  ;;  %v1047_v40 = vpop.f32.mrf.mxu0  ;;  %2279 = vmatmul.mubr.msk.f32.gmra.mxu1 %vm615_vm3, %v3045_v55 }
 0x2a2   :  { %v3276_v41 = vadd.f32 %v1740_v37, %v1708_v36  ;;  %v3278_v42 = vmul.f32 %v1497_v35, %v1047_v40  ;;  %1440 = vmatprep.mubr.f32.mxu1 %v2407_v0 }
 0x2a3   :  { %v3281_v43 = vpop.f32.mrf.mxu1  ;;  %v1049_v44 = vpop.f32.mrf.mxu0 }
 0x2a4   :  { %4612 = vst [vmem:[#allocation21_spill] sm:$0xff] %v3276_v41  ;;  %4613 = vst [vmem:[#allocation22_spill] sm:$0xff] %v3278_v42  ;;  %v1741_v47 = vmul.f32 %v3278_v42, %v1049_v44 }
 0x2a5   :  { %v3288_v48 = vpop.f32.mrf.mxu1  ;;  %v1053_v49 = vpop.f32.mrf.mxu0  ;;  %2280 = vmatmul.mubr.msk.f32.gmra.mxu1 %vm615_vm3, %v3055_v58 }
 0x2a6   :  { %v3295_v55 = vadd.f32 %v1741_v47, %v1709_v46  ;;  %v3297_v56 = vmul.f32 %v1502_v45, %v1053_v49  ;;  %1446 = vmatprep.mubr.f32.mxu1 %v2407_v0 }
 0x2a7   :  { %v3300_v57 = vpop.f32.mrf.mxu1  ;;  %v1055_v60 = vpop.f32.mrf.mxu0 }
 0x2a8   :  { %4614 = vst [vmem:[#allocation23_spill] sm:$0xff] %v3295_v55  ;;  %4615 = vst [vmem:[#allocation24_spill] sm:$0xff] %v3297_v56  ;;  %v1742_v58 = vmul.f32 %v3297_v56, %v1055_v60 }
 0x2a9   :  { %4616 = vst [vmem:[#allocation25_spill] sm:$0xff] %v3300_v57  ;;  %v3307_v2 = vpop.f32.mrf.mxu1  ;;  %v1059_v6 = vpop.f32.mrf.mxu0  ;;  %2281 = vmatmul.mubr.msk.f32.gmra.mxu1 %vm615_vm3, %v3065_v59 }
 0x2aa   :  { %v3314_v19 = vadd.f32 %v1742_v58, %v1710_v1  ;;  %v3316_v21 = vmul.f32 %v1507_v61, %v1059_v6  ;;  %1452 = vmatprep.mubr.f32.mxu1 %v2407_v0  ;;  %v3378_v61 = vld [vmem:[%s4464_s2] sm:$0x3] }
 0x2ab   :  { %v3319_v24 = vpop.f32.mrf.mxu1  ;;  %v1061_v25 = vpop.f32.mrf.mxu0  ;;  %4625 = vst [vmem:[#allocation34_spill] sm:$0xff] %v3378_v61  ;;  %v3389_v6 = vrot.slane %v3378_v61, %v190_v52 }
 0x2ac   :  { %4617 = vst [vmem:[#allocation26_spill] sm:$0xff] %v3314_v19  ;;  %4618 = vst [vmem:[#allocation27_spill] sm:$0xff] %v3316_v21  ;;  %v1743_v27 = vmul.f32 %v3316_v21, %v1061_v25 }
 0x2ad   :  { %4619 = vst [vmem:[#allocation28_spill] sm:$0xff] %v3319_v24  ;;  %v3323_v28 = vpop.f32.mrf.mxu1  ;;  %v3325_v59 = vpop.f32.mrf.mxu0  ;;  %2282 = vmatmul.mubr.msk.f32.gmra.mxu1 %vm615_vm3, %v3075_v62  ;;  %4628 = vst [vmem:[#allocation37_spill] sm:$0xff] %v3389_v6 }
 0x2ae   :  { %v3329_v30 = vadd.f32 %v1743_v27, %v1711_v26  ;;  %1458 = vmatprep.mubr.f32.mxu1 %v2407_v0  ;;  %v4481_v27 = vmov 1.0  }
 0x2af   :  { %v3332_v34 = vpop.f32.mrf.mxu1  ;;  %v3334_v35 = vpop.f32.mrf.mxu0 }
 0x2b0   :  { %4620 = vst [vmem:[#allocation29_spill] sm:$0xff] %v3329_v30  ;;  %4621 = vst [vmem:[#allocation30_spill] sm:$0xff] %v3332_v34  ;;  %v1564_v30 = vld [vmem:[%s4463_s1 + $0x288] sm:$0xff] }
 0x2b1   :  { %v3336_v36 = vpop.f32.mrf.mxu1  ;;  %v3338_v37 = vpop.f32.mrf.mxu0  ;;  %2283 = vmatmul.mubr.msk.f32.gmra.mxu1 %vm615_vm3, %v3085_v63 }
 0x2b2   :  { %1464 = vmatprep.mubr.f32.mxu1 %v2407_v0 }
 0x2b3   :  { %v3343_v38 = vpop.f32.mrf.mxu1  ;;  %v3345_v62 = vpop.f32.mrf.mxu0 }
 0x2b4   :  { %4622 = vst [vmem:[#allocation31_spill] sm:$0xff] %v3343_v38 }
 0x2b5   :  { %v3347_v40 = vpop.f32.mrf.mxu1  ;;  %v3349_v44 = vpop.f32.mrf.mxu0  ;;  %2284 = vmatmul.mubr.msk.f32.gmra.mxu1 %vm615_vm3, %v3095_v5 }
 0x2b6   :  { %1470 = vmatprep.mubr.f32.mxu1 %v2407_v0 }
 0x2b7   :  { %v3354_v45 = vpop.f32.mrf.mxu1  ;;  %v3356_v46 = vpop.f32.mrf.mxu0 }
 0x2b8   :  { %4623 = vst [vmem:[#allocation32_spill] sm:$0xff] %v3354_v45 }
 0x2b9   :  { %v3358_v63 = vpop.f32.mrf.mxu1  ;;  %v3360_v47 = vpop.f32.mrf.mxu0  ;;  %2285 = vmatmul.mubr.msk.f32.gmra.mxu1 %vm615_vm3, %v3105_v7 }
 0x2ba   :  { %1476 = vmatprep.mubr.f32.mxu1 %v2407_v0 }
 0x2bb   :  { %v3365_v49 = vpop.f32.mrf.mxu1  ;;  %v3367_v50 = vpop.f32.mrf.mxu0 }
 0x2bc   :  { %4624 = vst [vmem:[#allocation33_spill] sm:$0xff] %v3365_v49  ;;  %v1721_v3 = vmul.f32 %v1554_v54, %v3365_v49 }
 0x2bd   :  { %v3369_v5 = vpop.f32.mrf.mxu1  ;;  %v3371_v60 = vpop.f32.mrf.mxu0  ;;  %2286 = vmatmul.mubr.msk.f32.gmra.mxu1 %vm615_vm3, %v3115_v8  ;;  %vm604_vm3 = vcmp.eq.s32.totalorder %v2795_v51, %v3389_v6 }
 0x2be   :  { %2287 = vmatprep.mubr.msk.f32.mxu0 %vm604_vm3, %v4481_v27  ;;  %v1557_v27 = vld [vmem:[%s4463_s1 + $0x250] sm:$0xff] }
 0x2bf   :  { %v3380_v1 = vpop.f32.mrf.mxu1  ;;  %v3382_v7 = vpop.f32.mrf.mxu0 }
 0x2c0   :  { %4626 = vst [vmem:[#allocation35_spill] sm:$0xff] %v3380_v1 }
 0x2c1   :  { %v3384_v0 = vpop.f32.mrf.mxu1  ;;  %v1095_v58 = vpop.f32.mrf.mxu0 }
 0x2c2   :  { %4627 = vst [vmem:[#allocation36_spill] sm:$0xff] %v3384_v0 }
 0x2c3   :  { %v3391_v18 = vpop.f32.mrf.mxu1  ;;  %v3393_v8 = vpop.f32.mrf.mxu0 }
 0x2c4   :  { %4629 = vst [vmem:[#allocation38_spill] sm:$0xff] %v3391_v18 }
 0x2c5   :  { %v3395_v25 = vpop.f32.mrf.mxu1  ;;  %v1101_v26 = vpop.f32.mrf.mxu0 }
 0x2c6   :  { %4630 = vst [vmem:[#allocation39_spill] sm:$0xff] %v3395_v25 }
 0x2c7   :  { %v3403_v53 = vpop.f32.mrf.mxu1  ;;  %v3405_v52 = vpop.f32.mrf.mxu0 }
 0x2c8   :  { %4631 = vst [vmem:[#allocation40_spill] sm:$0xff] %v3403_v53 }
 0x2c9   :  { %v3407_v0 = vpop.f32.mrf.mxu1  ;;  %v1107_v61 = vpop.f32.mrf.mxu0 }
 0x2ca   :  { %4632 = vst [vmem:[#allocation41_spill] sm:$0xff] %v3407_v0  ;;  %v1552_v0 = vld [vmem:[%s4463_s1 + $0x228] sm:$0xff] }
 0x2cb   :  { %v3409_v21 = vpop.f32.mrf.mxu1  ;;  %v1109_v25 = vpop.f32.mrf.mxu0 }
 0x2cc   :  { %4633 = vst [vmem:[#allocation42_spill] sm:$0xff] %v3409_v21 }
 0x2cd   :  { %v3411_v13 = vpop.f32.mrf.mxu1  ;;  %v1113_v56 = vpop.f32.mrf.mxu0 }
 0x2ce   :  { %4634 = vst [vmem:[#allocation43_spill] sm:$0xff] %v3411_v13  ;;  %v1562_v13 = vld [vmem:[%s4463_s1 + $0x278] sm:$0xff]  ;;  %v3441_v41 = vmul.f32 %v1552_v0, %v1113_v56  ;;  %v1537_v56 = vld [vmem:[%s4463_s1 + $0x1b0] sm:$0xff]  ;;  %v3463_v0 = vmul.f32 %v1547_v22, %v1107_v61 }
 0x2cf   :  { %v3413_v9 = vpop.f32.mrf.mxu1  ;;  %v1115_v42 = vpop.f32.mrf.mxu0  ;;  %v1553_v22 = vld [vmem:[%s4463_s1 + $0x230] sm:$0xff] }
 0x2d0   :  { %4635 = vst [vmem:[#allocation44_spill] sm:$0xff] %v3413_v9  ;;  %4640 = vst [vmem:[#allocation49_spill] sm:$0xff] %v3441_v41 }
 0x2d1   :  { %v3415_v16 = vpop.f32.mrf.mxu1  ;;  %v1119_v6 = vpop.f32.mrf.mxu0  ;;  %4643 = vst [vmem:[#allocation52_spill] sm:$0xff] %v3463_v0 }
 0x2d2   :  { %4636 = vst [vmem:[#allocation45_spill] sm:$0xff] %v3415_v16  ;;  %v3428_v12 = vmul.f32 %v1557_v27, %v1119_v6  ;;  %v1559_v16 = vld [vmem:[%s4463_s1 + $0x260] sm:$0xff]  ;;  %v1542_v6 = vld [vmem:[%s4463_s1 + $0x1d8] sm:$0xff] }
 0x2d3   :  { %v3423_v51 = vpop.f32.mrf.mxu1  ;;  %v1121_v32 = vpop.f32.mrf.mxu0  ;;  %v3482_v54 = vmul.f32 %v1542_v6, %v1101_v26  ;;  %v1657_v6 = vmul.f32 %v1553_v22, %v3358_v63  ;;  %v1522_v63 = vld [vmem:[%s4463_s1 + $0x138] sm:$0xff] }
 0x2d4   :  { %4637 = vst [vmem:[#allocation46_spill] sm:$0xff] %v3423_v51  ;;  %4638 = vst [vmem:[#allocation47_spill] sm:$0xff] %v3428_v12  ;;  %v1572_v51 = vld [vmem:[%s4463_s1 + $0x2c8] sm:$0xff] }
 0x2d5   :  { %v3436_v4 = vpop.f32.mrf.mxu1  ;;  %v1125_v31 = vpop.f32.mrf.mxu0  ;;  %4645 = vst [vmem:[#allocation54_spill] sm:$0xff] %v3482_v54 }
 0x2d6   :  { %4639 = vst [vmem:[#allocation48_spill] sm:$0xff] %v3436_v4  ;;  %v3443_v10 = vmul.f32 %v1562_v13, %v1125_v31  ;;  %v1567_v4 = vld [vmem:[%s4463_s1 + $0x2a0] sm:$0xff]  ;;  %v1558_v13 = vld [vmem:[%s4463_s1 + $0x258] sm:$0xff]  ;;  %v1722_v31 = vmul.f32 %v1559_v16, %v3380_v1  ;;  %v1544_v16 = vld [vmem:[%s4463_s1 + $0x1e8] sm:$0xff] }
 0x2d7   :  { %v3448_v27 = vpop.f32.mrf.mxu1  ;;  %v1127_v55 = vpop.f32.mrf.mxu0  ;;  %v1658_v1 = vmul.f32 %v1558_v13, %v3369_v5  ;;  %v1719_v26 = vmul.f32 %v1544_v16, %v3343_v38 }
 0x2d8   :  { %4641 = vst [vmem:[#allocation50_spill] sm:$0xff] %v3443_v10  ;;  %4642 = vst [vmem:[#allocation51_spill] sm:$0xff] %v3448_v27  ;;  %v1753_v27 = vmul.f32 %v3428_v12, %v1121_v32  ;;  %v1754_v19 = vmul.f32 %v3443_v10, %v1127_v55  ;;  %v1532_v32 = vld [vmem:[%s4463_s1 + $0x188] sm:$0xff]  ;;  %v1752_v55 = vmul.f32 %v3441_v41, %v1115_v42  ;;  %v1539_v42 = vld [vmem:[%s4463_s1 + $0x1c0] sm:$0xff] }
 0x2d9   :  { %v3471_v11 = vpop.f32.mrf.mxu1  ;;  %v1131_v15 = vpop.f32.mrf.mxu0  ;;  %v1720_v12 = vmul.f32 %v1549_v14, %v3354_v45  ;;  %v3489_v10 = vmul.f32 %v1537_v56, %v1095_v58  ;;  %v1527_v14 = vld [vmem:[%s4463_s1 + $0x160] sm:$0xff]  ;;  %v3511_v13 = vmul.f32 %v1532_v32, %v3371_v60  ;;  %v1750_v60 = vmul.f32 %v3482_v54, %v3405_v52  ;;  %v1538_v52 = vld [vmem:[%s4463_s1 + $0x1b8] sm:$0xff] }
 0x2da   :  { %4644 = vst [vmem:[#allocation53_spill] sm:$0xff] %v3471_v11  ;;  %v1786_v61 = vadd.f32 %v1754_v19, %v1722_v31  ;;  %v3485_v49 = vmul.f32 %v1567_v4, %v1131_v15  ;;  %v1548_v4 = vld [vmem:[%s4463_s1 + $0x208] sm:$0xff]  ;;  %v1723_v15 = vmul.f32 %v1564_v30, %v3391_v18  ;;  %v1751_v19 = vmul.f32 %v3463_v0, %v1109_v25  ;;  %v1569_v31 = vld [vmem:[%s4463_s1 + $0x2b0] sm:$0xff]  ;;  %v4687_v41 = vld [vmem:[#allocation22_spill] sm:$0xff] }
 0x2db   :  { %4647 = vst [vmem:[#allocation56_spill] sm:$0xff] %v3489_v10  ;;  %v3491_v11 = vpop.f32.mrf.mxu1  ;;  %v1133_v20 = vpop.f32.mrf.mxu0  ;;  %v1785_v5 = vadd.f32 %v1753_v27, %v1721_v3  ;;  %4649 = vst [vmem:[#allocation58_spill] sm:$0xff] %v3511_v13  ;;  %v1534_v3 = vld [vmem:[%s4463_s1 + $0x198] sm:$0xff]  ;;  %v1784_v25 = vadd.f32 %v1752_v55, %v1720_v12  ;;  %v1656_v22 = vmul.f32 %v1548_v4, %v3347_v40  ;;  %v1577_v12 = vld [vmem:[%s4463_s1 + $0x2f0] sm:$0xff] }
 0x2dc   :  { %4646 = vst [vmem:[#allocation55_spill] sm:$0xff] %v3485_v49  ;;  %4648 = vst [vmem:[#allocation57_spill] sm:$0xff] %v3491_v11  ;;  %v1755_v58 = vmul.f32 %v3485_v49, %v1133_v20  ;;  %1999 = vmatprep.subr.mxu0 %v1786_v61  ;;  %v1543_v20 = vld [vmem:[%s4463_s1 + $0x1e0] sm:$0xff]  ;;  %v3536_v32 = vmul.f32 %v1527_v14, %v3360_v47  ;;  %v1517_v40 = vld [vmem:[%s4463_s1 + $0x110] sm:$0xff]  ;;  %v1749_v47 = vmul.f32 %v3489_v10, %v3393_v8 }
 0x2dd   :  { %v3516_v56 = vpop.f32.mrf.mxu1  ;;  %v1137_v30 = vpop.f32.mrf.mxu0  ;;  %2000 = vmatpush1.msra.mxu0 %v1658_v1  ;;  %v1718_v1 = vmul.f32 %v1539_v42, %v3332_v34  ;;  %v1724_v55 = vmul.f32 %v1569_v31, %v3403_v53  ;;  %v1783_v42 = vadd.f32 %v1751_v19, %v1719_v26  ;;  %v1717_v14 = vmul.f32 %v1534_v3, %v3319_v24  ;;  %v1533_v19 = vld [vmem:[%s4463_s1 + $0x190] sm:$0xff]  ;;  %v4681_v10 = vld [vmem:[#allocation10_spill] sm:$0xff]  ;;  %v4683_v53 = vld [vmem:[#allocation19_spill] sm:$0xff] }
 0x2de   :  { %v3529_v27 = vadd.f32 %v1755_v58, %v1723_v15  ;;  %v3531_v16 = vmul.f32 %v1572_v51, %v1137_v30  ;;  %2001 = vmatprep.subr.mxu0 %v1785_v5  ;;  %4651 = vst [vmem:[#allocation60_spill] sm:$0xff] %v3536_v32  ;;  %v1529_v51 = vld [vmem:[%s4463_s1 + $0x170] sm:$0xff]  ;;  %v1655_v15 = vmul.f32 %v1543_v20, %v3336_v36  ;;  %v1574_v58 = vld [vmem:[%s4463_s1 + $0x2d8] sm:$0xff]  ;;  %v1512_v36 = vld [vmem:[%s4463_s1 + $0xe8] sm:$0xff] }
 0x2df   :  { %v3538_v61 = vpop.f32.mrf.mxu1  ;;  %v1139_v0 = vpop.f32.mrf.mxu0  ;;  %2002 = vmatpush1.msra.mxu0 %v1657_v6  ;;  %v3559_v5 = vmul.f32 %v1522_v63, %v3349_v44  ;;  %v1748_v44 = vmul.f32 %v3511_v13, %v3382_v7  ;;  %v1782_v26 = vadd.f32 %v1750_v60, %v1718_v1  ;;  %v1716_v3 = vmul.f32 %v1529_v51, %v3300_v57  ;;  %v1582_v7 = vld [vmem:[%s4463_s1 + $0x318] sm:$0xff]  ;;  %v1528_v60 = vld [vmem:[%s4463_s1 + $0x168] sm:$0xff]  ;;  %v1519_v1 = vld [vmem:[%s4463_s1 + $0x120] sm:$0xff] }
 0x2e0   :  { %4650 = vst [vmem:[#allocation59_spill] sm:$0xff] %v3531_v16  ;;  %4652 = vst [vmem:[#allocation61_spill] sm:$0xff] %v3538_v61  ;;  %v1756_v4 = vmul.f32 %v3531_v16, %v1139_v0  ;;  %2003 = vmatprep.subr.mxu0 %v1784_v25  ;;  %v1524_v0 = vld [vmem:[%s4463_s1 + $0x148] sm:$0xff]  ;;  %v1654_v20 = vmul.f32 %v1538_v52, %v3323_v28  ;;  %v3584_v63 = vmul.f32 %v1517_v40, %v3338_v37 }
 0x2e1   :  { %4653 = vst [vmem:[#allocation62_spill] sm:$0xff] %v3559_v5  ;;  %v3564_v6 = vpop.f32.mrf.mxu1  ;;  %v1143_v8 = vpop.f32.mrf.mxu0  ;;  %2004 = vmatpush1.msra.mxu0 %v1656_v22  ;;  %v1747_v28 = vmul.f32 %v3536_v32, %v3367_v50  ;;  %v1781_v37 = vadd.f32 %v1749_v47, %v1717_v14  ;;  %v1715_v52 = vmul.f32 %v1524_v0, %v3281_v43  ;;  %v1523_v47 = vld [vmem:[%s4463_s1 + $0x140] sm:$0xff]  ;;  %v1514_v14 = vld [vmem:[%s4463_s1 + $0xf8] sm:$0xff] }
 0x2e2   :  { %v3577_v31 = vadd.f32 %v1756_v4, %v1724_v55  ;;  %v3579_v30 = vmul.f32 %v1577_v12, %v1143_v8  ;;  %2005 = vmatprep.subr.mxu0 %v1783_v42  ;;  %4655 = vst [vmem:[#allocation64_spill] sm:$0xff] %v3584_v63  ;;  %v1725_v12 = vmul.f32 %v1574_v58, %v3409_v21  ;;  %v1579_v42 = vld [vmem:[%s4463_s1 + $0x300] sm:$0xff] }
 0x2e3   :  { %v3586_v25 = vpop.f32.mrf.mxu1  ;;  %v1145_v22 = vpop.f32.mrf.mxu0  ;;  %2006 = vmatpush1.msra.mxu0 %v1655_v15  ;;  %v1653_v40 = vmul.f32 %v1533_v19, %v3307_v2  ;;  %v3604_v55 = vmul.f32 %v1512_v36, %v3325_v59  ;;  %v1746_v2 = vmul.f32 %v3559_v5, %v3356_v46  ;;  %v1780_v59 = vadd.f32 %v1748_v44, %v1716_v3  ;;  %v1518_v46 = vld [vmem:[%s4463_s1 + $0x118] sm:$0xff]  ;;  %v1491_v21 = vld [vmem:[%s4463_s1 + $0x40] sm:$0xff] }
 0x2e4   :  { %4654 = vst [vmem:[#allocation63_spill] sm:$0xff] %v3579_v30  ;;  %4656 = vst [vmem:[#allocation65_spill] sm:$0xff] %v3586_v25  ;;  %v1757_v51 = vmul.f32 %v3579_v30, %v1145_v22  ;;  %2007 = vmatprep.subr.mxu0 %v1782_v26  ;;  %v1652_v8 = vmul.f32 %v1528_v60, %v3288_v48  ;;  %v1714_v0 = vmul.f32 %v1519_v1, %v3262_v33  ;;  %v1587_v26 = vld [vmem:[%s4463_s1 + $0x340] sm:$0xff]  ;;  %v1584_v1 = vld [vmem:[%s4463_s1 + $0x328] sm:$0xff] }
 0x2e5   :  { %4657 = vst [vmem:[#allocation66_spill] sm:$0xff] %v3604_v55  ;;  %v3609_v4 = vpop.f32.mrf.mxu1  ;;  %v1149_v50 = vpop.f32.mrf.mxu0  ;;  %2008 = vmatpush1.msra.mxu0 %v1654_v20  ;;  %v1745_v44 = vmul.f32 %v3584_v63, %v3345_v62  ;;  %v1779_v3 = vadd.f32 %v1747_v28, %v1715_v52  ;;  %v1726_v48 = vmul.f32 %v1579_v42, %v3413_v9  ;;  %v1513_v28 = vld [vmem:[%s4463_s1 + $0xf0] sm:$0xff] }
 0x2e6   :  { %v3619_v15 = vadd.f32 %v1757_v51, %v1725_v12  ;;  %v3621_v58 = vmul.f32 %v1582_v7, %v1149_v50  ;;  %2009 = vmatprep.subr.mxu0 %v1781_v37  ;;  %v1651_v22 = vmul.f32 %v1523_v47, %v3272_v39  ;;  %v1509_v7 = vld [vmem:[%s4463_s1 + $0xd0] sm:$0xff]  ;;  %v1713_v60 = vmul.f32 %v1514_v14, %v3243_v23  ;;  %v1508_v47 = vld [vmem:[%s4463_s1 + $0xc8] sm:$0xff] }
 0x2e7   :  { %v3625_v19 = vpop.f32.mrf.mxu1  ;;  %v1151_v36 = vpop.f32.mrf.mxu0  ;;  %2010 = vmatpush1.msra.mxu0 %v1653_v40  ;;  %v1744_v39 = vmul.f32 %v3604_v55, %v3334_v35  ;;  %v1778_v12 = vadd.f32 %v1746_v2, %v1714_v0  ;;  %v1650_v40 = vmul.f32 %v1518_v46, %v3253_v29  ;;  %v1712_v14 = vmul.f32 %v1509_v7, %v3228_v17  ;;  %v4662_v35 = vld [vmem:[#allocation46_spill] sm:$0xff]  ;;  %v4663_v0 = vld [vmem:[#allocation16_spill] sm:$0xff]  ;;  %v1503_v46 = vld [vmem:[%s4463_s1 + $0xa0] sm:$0xff] }
 0x2e8   :  { %4658 = vst [vmem:[#allocation67_spill] sm:$0xff] %v3621_v58  ;;  %4659 = vst [vmem:[#allocation68_spill] sm:$0xff] %v3625_v19  ;;  %v1758_v20 = vmul.f32 %v3621_v58, %v1151_v36  ;;  %2011 = vmatprep.subr.mxu0 %v1780_v59  ;;  %v1777_v59 = vadd.f32 %v1745_v44, %v1713_v60  ;;  %v1727_v2 = vmul.f32 %v1584_v1, %v4662_v35  ;;  %v4664_v44 = vld [vmem:[#allocation13_spill] sm:$0xff]  ;;  %v1498_v60 = vld [vmem:[%s4463_s1 + $0x78] sm:$0xff] }
 0x2e9   :  { %v3645_v37 = vpop.f32.mrf.mxu1  ;;  %v1155_v62 = vpop.f32.mrf.mxu0  ;;  %2012 = vmatpush1.msra.mxu0 %v1652_v8  ;;  %v1649_v36 = vmul.f32 %v1513_v28, %v4663_v0  ;;  %v4666_v1 = vld [vmem:[#allocation9_spill] sm:$0xff]  ;;  %v4671_v0 = vld [vmem:[#allocation12_spill] sm:$0xff]  ;;  %v4676_v17 = vld [vmem:[#allocation18_spill] sm:$0xff] }
 0x2ea   :  { %v3652_v51 = vadd.f32 %v1758_v20, %v1726_v48  ;;  %v3654_v52 = vmul.f32 %v1587_v26, %v1155_v62  ;;  %2013 = vmatprep.subr.mxu0 %v1779_v3  ;;  %v1776_v3 = vadd.f32 %v1744_v39, %v1712_v14  ;;  %v1648_v20 = vmul.f32 %v1508_v47, %v4664_v44  ;;  %v1483_v44 = vld [vmem:[%s4463_s1] sm:$0xff]  ;;  %v4679_v35 = vld [vmem:[#allocation17_spill] sm:$0xff]  ;;  %v1490_v58 = vld [vmem:[%s4463_s1 + $0x38] sm:$0xff] }
 0x2eb   :  { %v3657_v42 = vpop.f32.mrf.mxu1  ;;  %v1157_v50 = vpop.f32.mrf.mxu0  ;;  %2014 = vmatpush1.msra.mxu0 %v1651_v22  ;;  %v1647_v62 = vmul.f32 %v1503_v46, %v4666_v1  ;;  %v1804_v16 = vmul.f32 %v1490_v58, %v4681_v10 }
 0x2ec   :  { %4660 = vst [vmem:[#allocation69_spill] sm:$0xff] %v3654_v52  ;;  %4661 = vst [vmem:[#allocation70_spill] sm:$0xff] %v3657_v42  ;;  %v1759_v8 = vmul.f32 %v3654_v52, %v1157_v50  ;;  %2015 = vmatprep.subr.mxu0 %v1778_v12  ;;  %v1493_v12 = vld [vmem:[%s4463_s1 + $0x50] sm:$0xff] }
 0x2ed   :  { %v3666_v26 = vpop.f32.mrf.mxu1  ;;  %v3668_v29 = vpop.f32.mrf.mxu0  ;;  %2016 = vmatpush1.msra.mxu0 %v1650_v40  ;;  %v4667_v40 = vld [vmem:[#allocation29_spill] sm:$0xff] }
 0x2ee   :  { %v3673_v48 = vadd.f32 %v1759_v8, %v1727_v2  ;;  %2017 = vmatprep.subr.mxu0 %v1777_v59  ;;  %v4668_v50 = vld [vmem:[#allocation5_spill] sm:$0xff]  ;;  %v1488_v2 = vld [vmem:[%s4463_s1 + $0x28] sm:$0xff]  ;;  %v4670_v8 = vld [vmem:[#allocation26_spill] sm:$0xff] }
 0x2ef   :  { %v3676_v22 = vpop.f32.mrf.mxu1  ;;  %v3678_v7 = vpop.f32.mrf.mxu0  ;;  %2018 = vmatpush1.msra.mxu0 %v1649_v36  ;;  %v1646_v47 = vmul.f32 %v1498_v60, %v4668_v50  ;;  %v1645_v36 = vmul.f32 %v1493_v12, %v4671_v0  ;;  %v4673_v60 = vld [vmem:[#allocation8_spill] sm:$0xff]  ;;  %v4674_v50 = vld [vmem:[#allocation21_spill] sm:$0xff] }
 0x2f0   :  { %4665 = vst [vmem:[#allocation16_spill] sm:$0xff] %v3676_v22  ;;  %2019 = vmatprep.subr.mxu0 %v1776_v3  ;;  %v1644_v1 = vmul.f32 %v1488_v2, %v4673_v60  ;;  %v4675_v12 = vld [vmem:[#allocation4_spill] sm:$0xff] }
 0x2f1   :  { %v3684_v28 = vpop.f32.mrf.mxu1  ;;  %v3686_v39 = vpop.f32.mrf.mxu0  ;;  %2020 = vmatpush1.msra.mxu0 %v1648_v20  ;;  %v4672_v20 = vld [vmem:[#allocation23_spill] sm:$0xff] }
 0x2f2   :  { %2021 = vmatprep.subr.mxu0 %v4667_v40 }
 0x2f3   :  { %v3693_v14 = vpop.f32.mrf.mxu1  ;;  %v3695_v59 = vpop.f32.mrf.mxu0  ;;  %2022 = vmatpush1.msra.mxu0 %v1647_v62 }
 0x2f4   :  { %4669 = vst [vmem:[#allocation13_spill] sm:$0xff] %v3693_v14  ;;  %2023 = vmatprep.subr.mxu0 %v4670_v8  ;;  %v1643_v8 = vmul.f32 %v1483_v44, %v4675_v12 }
 0x2f5   :  { %v3702_v46 = vpop.f32.mrf.mxu1  ;;  %v3704_v3 = vpop.f32.mrf.mxu0  ;;  %2024 = vmatpush1.msra.mxu0 %v1646_v47 }
 0x2f6   :  { %2025 = vmatprep.subr.mxu0 %v4672_v20 }
 0x2f7   :  { %v3711_v62 = vpop.f32.mrf.mxu1  ;;  %v3713_v40 = vpop.f32.mrf.mxu0  ;;  %2026 = vmatpush1.msra.mxu0 %v1645_v36  ;;  %v1485_v36 = vld [vmem:[%s4463_s1 + $0x10] sm:$0xff] }
 0x2f8   :  { %2027 = vmatprep.subr.mxu0 %v4674_v50 }
 0x2f9   :  { %v3717_v0 = vpop.f32.mrf.mxu1  ;;  %v3719_v47 = vpop.f32.mrf.mxu0  ;;  %2028 = vmatpush1.msra.mxu0 %v1644_v1 }
 0x2fa   :  { %2029 = vmatprep.subr.mxu0 %v4676_v17  ;;  %v1486_v17 = vld [vmem:[%s4463_s1 + $0x18] sm:$0xff] }
 0x2fb   :  { %v3722_v52 = vpop.f32.mrf.mxu1  ;;  %v3724_v20 = vpop.f32.mrf.mxu0  ;;  %2030 = vmatpush1.msra.mxu0 %v1643_v8  ;;  %v4678_v8 = vld [vmem:[#allocation6_spill] sm:$0xff] }
 0x2fc   :  { %v1803_v55 = vmul.f32 %v1485_v36, %v4678_v8  ;;  %v1899_v32 = vmul.f32 %v1486_v17, %v4678_v8 }
 0x2fd   :  { %v3726_v2 = vpop.f32.mrf.mxu1  ;;  %v3728_v60 = vpop.f32.mrf.mxu0 }
 0x2ff   :  { %v3733_v44 = vpop.f32.mrf.mxu1  ;;  %v3735_v50 = vpop.f32.mrf.mxu0 }
 0x300   :  { %4677 = vst [vmem:[#allocation9_spill] sm:$0xff] %v3733_v44 }
 0x301   :  { %v3740_v1 = vpop.f32.mrf.mxu0  ;;  %v1292_v12 = vpop.f32.mrf.mxu1 }
 0x302   :  { %v1835_v63 = vmul.f32 %v4679_v35, %v1292_v12 }
 0x303   :  { %v3747_v5 = vpop.f32.mrf.mxu0  ;;  %v1294_v9 = vpop.f32.mrf.mxu1 }
 0x304   :  { %v3750_v30 = vadd.f32 %v1835_v63, %v1803_v55  ;;  %v1931_v13 = vmul.f32 %v4679_v35, %v1294_v9  ;;  %v1495_v63 = vld [vmem:[%s4463_s1 + $0x60] sm:$0xff]  ;;  %v1900_v35 = vmul.f32 %v1491_v21, %v4681_v10  ;;  %v1500_v10 = vld [vmem:[%s4463_s1 + $0x88] sm:$0xff] }
 0x305   :  { %v3756_v36 = vpop.f32.mrf.mxu0  ;;  %v1298_v12 = vpop.f32.mrf.mxu1 }
 0x306   :  { %4680 = vst [vmem:[#allocation29_spill] sm:$0xff] %v3750_v30  ;;  %v3759_v54 = vadd.f32 %v1931_v13, %v1899_v32  ;;  %v1836_v49 = vmul.f32 %v4683_v53, %v1298_v12  ;;  %v1496_v13 = vld [vmem:[%s4463_s1 + $0x68] sm:$0xff]  ;;  %v4685_v12 = vld [vmem:[#allocation14_spill] sm:$0xff] }
 0x307   :  { %v3765_v55 = vpop.f32.mrf.mxu0  ;;  %v1300_v9 = vpop.f32.mrf.mxu1  ;;  %v1805_v30 = vmul.f32 %v1495_v63, %v4685_v12  ;;  %v1501_v63 = vld [vmem:[%s4463_s1 + $0x90] sm:$0xff] }
 0x308   :  { %4682 = vst [vmem:[#allocation5_spill] sm:$0xff] %v3759_v54  ;;  %v3768_v17 = vadd.f32 %v1836_v49, %v1804_v16  ;;  %v1932_v8 = vmul.f32 %v4683_v53, %v1300_v9  ;;  %v1901_v53 = vmul.f32 %v1496_v13, %v4685_v12  ;;  %v1637_v12 = vld [vmem:[%s4463_s1 + $0x4d0] sm:$0xff] }
 0x309   :  { %v1203_v32 = vpop.f32.mrf.mxu0  ;;  %v1304_v58 = vpop.f32.mrf.mxu1 }
 0x30a   :  { %4684 = vst [vmem:[#allocation26_spill] sm:$0xff] %v3768_v17  ;;  %v3775_v54 = vadd.f32 %v1932_v8, %v1900_v35  ;;  %v1837_v18 = vmul.f32 %v4687_v41, %v1304_v58  ;;  %v4690_v8 = vld [vmem:[#allocation7_spill] sm:$0xff]  ;;  %v4691_v17 = vld [vmem:[#allocation24_spill] sm:$0xff] }
 0x30b   :  { %v3778_v45 = vpop.f32.mrf.mxu0  ;;  %v1306_v38 = vpop.f32.mrf.mxu1  ;;  %v1806_v58 = vmul.f32 %v1500_v10, %v4690_v8 }
 0x30c   :  { %4686 = vst [vmem:[#allocation12_spill] sm:$0xff] %v3775_v54  ;;  %v3784_v21 = vadd.f32 %v1837_v18, %v1805_v30  ;;  %v1933_v49 = vmul.f32 %v4687_v41, %v1306_v38  ;;  %v1505_v18 = vld [vmem:[%s4463_s1 + $0xb0] sm:$0xff]  ;;  %v1902_v41 = vmul.f32 %v1501_v63, %v4690_v8  ;;  %v1642_v8 = vld [vmem:[%s4463_s1 + $0x4f8] sm:$0xff] }
 0x30d   :  { %v1209_v16 = vpop.f32.mrf.mxu0  ;;  %v1310_v9 = vpop.f32.mrf.mxu1 }
 0x30e   :  { %4688 = vst [vmem:[#allocation23_spill] sm:$0xff] %v3784_v21  ;;  %v3790_v35 = vadd.f32 %v1933_v49, %v1901_v53  ;;  %v1838_v54 = vmul.f32 %v4691_v17, %v1310_v9  ;;  %v1506_v53 = vld [vmem:[%s4463_s1 + $0xb8] sm:$0xff]  ;;  %v4694_v9 = vld [vmem:[#allocation11_spill] sm:$0xff] }
 0x30f   :  { %v1211_v34 = vpop.f32.mrf.mxu0  ;;  %v1312_v24 = vpop.f32.mrf.mxu1  ;;  %v1807_v21 = vmul.f32 %v1505_v18, %v4694_v9 }
 0x310   :  { %4689 = vst [vmem:[#allocation8_spill] sm:$0xff] %v3790_v35  ;;  %v3797_v30 = vadd.f32 %v1838_v54, %v1806_v58  ;;  %v1934_v38 = vmul.f32 %v4691_v17, %v1312_v24  ;;  %v4695_v54 = vld [vmem:[#allocation27_spill] sm:$0xff]  ;;  %v1632_v24 = vld [vmem:[%s4463_s1 + $0x4a8] sm:$0xff] }
 0x311   :  { %v1215_v13 = vpop.f32.mrf.mxu0  ;;  %v1316_v10 = vpop.f32.mrf.mxu1  ;;  %v3831_v33 = vmul.f32 %v1632_v24, %v1209_v16  ;;  %v1638_v16 = vld [vmem:[%s4463_s1 + $0x4d8] sm:$0xff] }
 0x312   :  { %4692 = vst [vmem:[#allocation21_spill] sm:$0xff] %v3797_v30  ;;  %v3807_v49 = vadd.f32 %v1934_v38, %v1902_v41  ;;  %v1839_v58 = vmul.f32 %v4695_v54, %v1316_v10  ;;  %v3817_v35 = vmul.f32 %v1637_v12, %v1215_v13  ;;  %v1903_v41 = vmul.f32 %v1506_v53, %v4694_v9  ;;  %v1639_v38 = vld [vmem:[%s4463_s1 + $0x4e0] sm:$0xff]  ;;  %v1634_v12 = vld [vmem:[%s4463_s1 + $0x4b8] sm:$0xff] }
 0x313   :  { %v1217_v17 = vpop.f32.mrf.mxu0  ;;  %v1318_v63 = vpop.f32.mrf.mxu1  ;;  %v1627_v10 = vld [vmem:[%s4463_s1 + $0x480] sm:$0xff]  ;;  %4698 = vst [vmem:[#allocation17_spill] sm:$0xff] %v3831_v33  ;;  %v1622_v53 = vld [vmem:[%s4463_s1 + $0x458] sm:$0xff] }
 0x314   :  { %4693 = vst [vmem:[#allocation4_spill] sm:$0xff] %v3807_v49  ;;  %4696 = vst [vmem:[#allocation18_spill] sm:$0xff] %v3817_v35  ;;  %v3819_v30 = vadd.f32 %v1839_v58, %v1807_v21  ;;  %v1935_v18 = vmul.f32 %v4695_v54, %v1318_v63  ;;  %v1738_v58 = vmul.f32 %v1639_v38, %v3733_v44  ;;  %v1633_v38 = vld [vmem:[%s4463_s1 + $0x4b0] sm:$0xff] }
 0x315   :  { %v1221_v49 = vpop.f32.mrf.mxu0  ;;  %v3829_v57 = vpop.f32.mrf.mxu1  ;;  %v3849_v24 = vmul.f32 %v1627_v10, %v1203_v32  ;;  %v1737_v32 = vmul.f32 %v1634_v12, %v3722_v52  ;;  %v1768_v10 = vmul.f32 %v3831_v33, %v1211_v34  ;;  %v1674_v44 = vmul.f32 %v1638_v16, %v3726_v2  ;;  %v1619_v2 = vld [vmem:[%s4463_s1 + $0x440] sm:$0xff] }
 0x316   :  { %4697 = vst [vmem:[#allocation6_spill] sm:$0xff] %v3819_v30  ;;  %v3833_v13 = vadd.f32 %v1935_v18, %v1903_v41  ;;  %v3835_v21 = vmul.f32 %v1642_v8, %v1221_v49  ;;  %v1769_v49 = vmul.f32 %v3817_v35, %v1217_v17  ;;  %v1629_v8 = vld [vmem:[%s4463_s1 + $0x490] sm:$0xff]  ;;  %v3866_v17 = vmul.f32 %v1622_v53, %v3756_v36  ;;  %v1624_v35 = vld [vmem:[%s4463_s1 + $0x468] sm:$0xff] }
 0x317   :  { %v1223_v9 = vpop.f32.mrf.mxu0  ;;  %v3843_v54 = vpop.f32.mrf.mxu1  ;;  %4700 = vst [vmem:[#allocation19_spill] sm:$0xff] %v3849_v24  ;;  %v1617_v41 = vld [vmem:[%s4463_s1 + $0x430] sm:$0xff]  ;;  %v1628_v36 = vld [vmem:[%s4463_s1 + $0x488] sm:$0xff]  ;;  %v1736_v12 = vmul.f32 %v1629_v8, %v3711_v62  ;;  %v1767_v53 = vmul.f32 %v3849_v24, %v3778_v45  ;;  %v1673_v16 = vmul.f32 %v1633_v38, %v3717_v0  ;;  %v1735_v45 = vmul.f32 %v1624_v35, %v3693_v14  ;;  %v1602_v38 = vld [vmem:[%s4463_s1 + $0x3b8] sm:$0xff] }
 0x318   :  { %4699 = vst [vmem:[#allocation10_spill] sm:$0xff] %v3835_v21  ;;  %v1770_v63 = vmul.f32 %v3835_v21, %v1223_v9  ;;  %4701 = vst [vmem:[#allocation14_spill] sm:$0xff] %v3866_v17  ;;  %v1612_v21 = vld [vmem:[%s4463_s1 + $0x408] sm:$0xff]  ;;  %v3883_v34 = vmul.f32 %v1617_v41, %v3740_v1  ;;  %v1623_v1 = vld [vmem:[%s4463_s1 + $0x460] sm:$0xff]  ;;  %v1766_v8 = vmul.f32 %v3866_v17, %v3765_v55 }
 0x319   :  { %v3859_v18 = vpop.f32.mrf.mxu1  ;;  %v1800_v0 = vadd.f32 %v1768_v10, %v1736_v12  ;;  %v1614_v41 = vld [vmem:[%s4463_s1 + $0x418] sm:$0xff]  ;;  %v1734_v55 = vmul.f32 %v1619_v2, %v3676_v22  ;;  %v1609_v10 = vld [vmem:[%s4463_s1 + $0x3f0] sm:$0xff]  ;;  %v1604_v2 = vld [vmem:[%s4463_s1 + $0x3c8] sm:$0xff] }
 0x31a   :  { %v1802_v9 = vadd.f32 %v1770_v63, %v1738_v58  ;;  %4702 = vst [vmem:[#allocation22_spill] sm:$0xff] %v3883_v34  ;;  %v1801_v58 = vadd.f32 %v1769_v49, %v1737_v32  ;;  %v1607_v63 = vld [vmem:[%s4463_s1 + $0x3e0] sm:$0xff]  ;;  %v3901_v49 = vmul.f32 %v1612_v21, %v3728_v60  ;;  %v1618_v60 = vld [vmem:[%s4463_s1 + $0x438] sm:$0xff]  ;;  %v1765_v21 = vmul.f32 %v3883_v34, %v3747_v5 }
 0x31b   :  { %v3876_v30 = vpop.f32.mrf.mxu1  ;;  %v3919_v35 = vmul.f32 %v1607_v63, %v3719_v47  ;;  %v1613_v47 = vld [vmem:[%s4463_s1 + $0x410] sm:$0xff]  ;;  %v1733_v5 = vmul.f32 %v1614_v41, %v3657_v42  ;;  %v1592_v63 = vld [vmem:[%s4463_s1 + $0x368] sm:$0xff]  ;;  %v4732_v34 = vld [vmem:[#allocation38_spill] sm:$0xff] }
 0x31c   :  { %2031 = vmatprep.subr.mxu0 %v1802_v9  ;;  %4703 = vst [vmem:[#allocation7_spill] sm:$0xff] %v3901_v49  ;;  %v1671_v9 = vmul.f32 %v1623_v1, %v3684_v28  ;;  %v1798_v28 = vadd.f32 %v1766_v8, %v1734_v55  ;;  %v1669_v41 = vmul.f32 %v1613_v47, %v3645_v37  ;;  %v1594_v37 = vld [vmem:[%s4463_s1 + $0x378] sm:$0xff]  ;;  %v4734_v17 = vld [vmem:[#allocation55_spill] sm:$0xff] }
 0x31d   :  { %v3894_v33 = vpop.f32.mrf.mxu1  ;;  %2032 = vmatpush2.msra.mxu0 %v1674_v44  ;;  %v1672_v44 = vmul.f32 %v1628_v36, %v3702_v46  ;;  %4704 = vst [vmem:[#allocation24_spill] sm:$0xff] %v3919_v35  ;;  %v1799_v46 = vadd.f32 %v1767_v53, %v1735_v45  ;;  %v1597_v36 = vld [vmem:[%s4463_s1 + $0x390] sm:$0xff]  ;;  %v3937_v53 = vmul.f32 %v1602_v38, %v3704_v3  ;;  %v1608_v3 = vld [vmem:[%s4463_s1 + $0x3e8] sm:$0xff]  ;;  %v1603_v38 = vld [vmem:[%s4463_s1 + $0x3c0] sm:$0xff] }
 0x31e   :  { %2033 = vmatprep.subr.mxu0 %v1801_v58  ;;  %v1764_v58 = vmul.f32 %v3901_v49, %v3735_v50  ;;  %v1732_v50 = vmul.f32 %v1609_v10, %v3625_v19  ;;  %v3955_v45 = vmul.f32 %v1597_v36, %v3686_v39  ;;  %v1763_v8 = vmul.f32 %v3919_v35, %v3724_v20  ;;  %v1598_v10 = vld [vmem:[%s4463_s1 + $0x398] sm:$0xff]  ;;  %v1589_v36 = vld [vmem:[%s4463_s1 + $0x350] sm:$0xff]  ;;  %v1571_v24 = vld [vmem:[%s4463_s1 + $0x2c0] sm:$0xff] }
 0x31f   :  { %v3912_v32 = vpop.f32.mrf.mxu1  ;;  %2034 = vmatpush2.msra.mxu0 %v1673_v16  ;;  %4705 = vst [vmem:[#allocation11_spill] sm:$0xff] %v3937_v53  ;;  %v1670_v16 = vmul.f32 %v1618_v60, %v3666_v26  ;;  %v1797_v26 = vadd.f32 %v1765_v21, %v1733_v5  ;;  %v1731_v39 = vmul.f32 %v1604_v2, %v3586_v25  ;;  %v1593_v5 = vld [vmem:[%s4463_s1 + $0x370] sm:$0xff]  ;;  %v4730_v25 = vld [vmem:[#allocation32_spill] sm:$0xff] }
 0x320   :  { %2035 = vmatprep.subr.mxu0 %v1800_v0  ;;  %4706 = vst [vmem:[#allocation27_spill] sm:$0xff] %v3955_v45  ;;  %v1599_v0 = vld [vmem:[%s4463_s1 + $0x3a0] sm:$0xff]  ;;  %v3970_v60 = vmul.f32 %v1592_v63, %v3668_v29  ;;  %v1762_v20 = vmul.f32 %v3937_v53, %v3713_v40  ;;  %v1796_v55 = vadd.f32 %v1764_v58, %v1732_v50 }
 0x321   :  { %v3930_v12 = vpop.f32.mrf.mxu1  ;;  %2036 = vmatpush2.msra.mxu0 %v1672_v44  ;;  %v1668_v21 = vmul.f32 %v1608_v3, %v3609_v4  ;;  %v1730_v29 = vmul.f32 %v1599_v0, %v3538_v61  ;;  %v1761_v40 = vmul.f32 %v3955_v45, %v3695_v59  ;;  %v1667_v4 = vmul.f32 %v1603_v38, %v3564_v6  ;;  %v1588_v6 = vld [vmem:[%s4463_s1 + $0x348] sm:$0xff]  ;;  %v4708_v63 = vld [vmem:[#allocation51_spill] sm:$0xff] }
 0x322   :  { %2037 = vmatprep.subr.mxu0 %v1799_v46  ;;  %4707 = vst [vmem:[#allocation71_spill] sm:$0xff] %v3970_v60  ;;  %v1729_v58 = vmul.f32 %v1594_v37, %v3491_v11  ;;  %v1760_v59 = vmul.f32 %v3970_v60, %v3678_v7  ;;  %v1666_v2 = vmul.f32 %v1598_v10, %v3516_v56  ;;  %v1583_v56 = vld [vmem:[%s4463_s1 + $0x320] sm:$0xff]  ;;  %v1573_v10 = vld [vmem:[%s4463_s1 + $0x2d0] sm:$0xff] }
 0x323   :  { %v3948_v1 = vpop.f32.mrf.mxu1  ;;  %2038 = vmatpush2.msra.mxu0 %v1671_v9  ;;  %v1795_v9 = vadd.f32 %v1763_v8, %v1731_v39  ;;  %v1728_v3 = vmul.f32 %v1589_v36, %v4708_v63  ;;  %v4709_v8 = vld [vmem:[#allocation53_spill] sm:$0xff]  ;;  %v1568_v36 = vld [vmem:[%s4463_s1 + $0x2a8] sm:$0xff]  ;;  %v4727_v60 = vld [vmem:[#allocation31_spill] sm:$0xff] }
 0x324   :  { %2039 = vmatprep.subr.mxu0 %v1798_v28  ;;  %v1794_v28 = vadd.f32 %v1762_v20, %v1730_v29  ;;  %v1793_v50 = vadd.f32 %v1761_v40, %v1729_v58  ;;  %v1578_v20 = vld [vmem:[%s4463_s1 + $0x2f8] sm:$0xff]  ;;  %v4712_v29 = vld [vmem:[#allocation43_spill] sm:$0xff] }
 0x325   :  { %v3963_v44 = vpop.f32.mrf.mxu1  ;;  %2040 = vmatpush2.msra.mxu0 %v1670_v16  ;;  %v1792_v7 = vadd.f32 %v1760_v59, %v1728_v3  ;;  %v1662_v40 = vmul.f32 %v1578_v20, %v4712_v29  ;;  %v4715_v58 = vld [vmem:[#allocation34_spill] sm:$0xff]  ;;  %v4718_v3 = vld [vmem:[#allocation39_spill] sm:$0xff]  ;;  %v1541_v20 = vld [vmem:[%s4463_s1 + $0x1d0] sm:$0xff] }
 0x326   :  { %2041 = vmatprep.subr.mxu0 %v1797_v26  ;;  %v1665_v26 = vmul.f32 %v1593_v5, %v4709_v8 }
 0x327   :  { %v3978_v46 = vpop.f32.mrf.mxu1  ;;  %2042 = vmatpush2.msra.mxu0 %v1669_v41  ;;  %v4710_v41 = vld [vmem:[#allocation48_spill] sm:$0xff] }
 0x328   :  { %2043 = vmatprep.subr.mxu0 %v1796_v55  ;;  %v1664_v38 = vmul.f32 %v1588_v6, %v4710_v41  ;;  %v4711_v55 = vld [vmem:[#allocation45_spill] sm:$0xff] }
 0x329   :  { %v3990_v47 = vpop.f32.mrf.mxu1  ;;  %2044 = vmatpush2.msra.mxu0 %v1668_v21  ;;  %v1663_v37 = vmul.f32 %v1583_v56, %v4711_v55  ;;  %v4720_v55 = vmov 1.0  }
 0x32a   :  { %2045 = vmatprep.subr.mxu0 %v1795_v9 }
 0x32b   :  { %v3999_v16 = vpop.f32.mrf.mxu1  ;;  %2046 = vmatpush2.msra.mxu0 %v1667_v4  ;;  %v4713_v4 = vld [vmem:[#allocation3_spill] sm:$0xff] }
 0x32c   :  { %2047 = vmatprep.subr.mxu0 %v1794_v28  ;;  %v4714_v5 = vsub.s32 0, %v4713_v4  ;;  %v4717_v28 = vld [vmem:[#allocation41_spill] sm:$0xff] }
 0x32d   :  { %v4006_v0 = vpop.f32.mrf.mxu1  ;;  %2048 = vmatpush2.msra.mxu0 %v1666_v2  ;;  %v1661_v2 = vmul.f32 %v1573_v10, %v4717_v28  ;;  %v1561_v10 = vld [vmem:[%s4463_s1 + $0x270] sm:$0xff]  ;;  %v1560_v28 = vld [vmem:[%s4463_s1 + $0x268] sm:$0xff] }
 0x32e   :  { %2049 = vmatprep.subr.mxu0 %v1793_v50  ;;  %v4034_v59 = vrot.slane %v4715_v58, %v4714_v5  ;;  %v1660_v50 = vmul.f32 %v1568_v36, %v4718_v3  ;;  %v1551_v5 = vld [vmem:[%s4463_s1 + $0x220] sm:$0xff]  ;;  %v1556_v58 = vld [vmem:[%s4463_s1 + $0x248] sm:$0xff] }
 0x32f   :  { %v4012_v39 = vpop.f32.mrf.mxu1  ;;  %2050 = vmatpush2.msra.mxu0 %v1665_v26  ;;  %v1912_v35 = vmul.f32 %v1551_v5, %v4730_v25 }
 0x330   :  { %2051 = vmatprep.subr.mxu0 %v1792_v7  ;;  %4716 = vst [vmem:[#allocation53_spill] sm:$0xff] %v4034_v59  ;;  %vm603_vm4 = vcmp.eq.s32.totalorder %v4713_v4, %v4034_v59  ;;  %v1526_v7 = vld [vmem:[%s4463_s1 + $0x158] sm:$0xff]  ;;  %v1565_v4 = vld [vmem:[%s4463_s1 + $0x290] sm:$0xff] }
 0x331   :  { %v4018_v21 = vpop.f32.mrf.mxu1  ;;  %2052 = vmatpush2.msra.mxu0 %v1664_v38  ;;  %v1531_v38 = vld [vmem:[%s4463_s1 + $0x180] sm:$0xff]  ;;  %v4080_v36 = vmul.f32 %v1526_v7, %v3281_v43  ;;  %v1819_v22 = vmul.f32 %v1565_v4, %v4732_v34  ;;  %v1545_v4 = vld [vmem:[%s4463_s1 + $0x1f0] sm:$0xff] }
 0x332   :  { %2053 = vmatprep.subr.mxu0 %v3673_v48  ;;  %v1563_v48 = vld [vmem:[%s4463_s1 + $0x280] sm:$0xff] }
 0x333   :  { %v4025_v9 = vpop.f32.mrf.mxu1  ;;  %2054 = vmatpush2.msra.mxu0 %v1663_v37  ;;  %v1546_v37 = vld [vmem:[%s4463_s1 + $0x1f8] sm:$0xff] }
 0x334   :  { %2055 = vmatprep.subr.mxu0 %v3652_v51  ;;  %v4719_v51 = vld [vmem:[#allocation36_spill] sm:$0xff]  ;;  %v1911_v11 = vmul.f32 %v1546_v37, %v4727_v60 }
 0x335   :  { %v1370_v6 = vpop.f32.mrf.mxu1  ;;  %2056 = vmatpush2.msra.mxu0 %v1662_v40  ;;  %v1659_v26 = vmul.f32 %v1563_v48, %v4719_v51  ;;  %v4722_v48 = vld [vmem:[#allocation20_spill] sm:$0xff]  ;;  %v4725_v40 = vld [vmem:[#allocation30_spill] sm:$0xff] }
 0x336   :  { %2057 = vmatprep.subr.mxu0 %v3619_v15  ;;  %v1516_v15 = vld [vmem:[%s4463_s1 + $0x108] sm:$0xff]  ;;  %v4104_v59 = vmul.f32 %v1541_v20, %v4725_v40  ;;  %v4729_v20 = vld [vmem:[#allocation47_spill] sm:$0xff] }
 0x337   :  { %v1372_v8 = vpop.f32.mrf.mxu1  ;;  %2058 = vmatpush2.msra.mxu0 %v1661_v2  ;;  %v4092_v2 = vmul.f32 %v1516_v15, %v3243_v23 }
 0x338   :  { %2059 = vmatprep.subr.mxu0 %v3577_v31  ;;  %v1521_v31 = vld [vmem:[%s4463_s1 + $0x130] sm:$0xff] }
 0x339   :  { %v1376_v56 = vpop.f32.mrf.mxu1  ;;  %2060 = vmatpush2.msra.mxu0 %v1660_v50  ;;  %v4095_v3 = vmul.f32 %v1521_v31, %v4722_v48  ;;  %v4723_v50 = vld [vmem:[#allocation25_spill] sm:$0xff]  ;;  %v1555_v31 = vld [vmem:[%s4463_s1 + $0x240] sm:$0xff] }
 0x33a   :  { %2061 = vmatprep.subr.mxu0 %v3529_v27  ;;  %v1536_v27 = vld [vmem:[%s4463_s1 + $0x1a8] sm:$0xff]  ;;  %v4098_v51 = vmul.f32 %v1531_v38, %v4723_v50  ;;  %v4728_v38 = vld [vmem:[#allocation35_spill] sm:$0xff]  ;;  %v1849_v49 = vmul.f32 %v4729_v20, %v1376_v56 }
 0x33b   :  { %v1378_v41 = vpop.f32.mrf.mxu1  ;;  %2062 = vmatpush2.msra.mxu0 %v1659_v26  ;;  %v4724_v26 = vld [vmem:[#allocation28_spill] sm:$0xff]  ;;  %v1914_v45 = vmul.f32 %v1561_v10, %v4728_v38  ;;  %v1818_v37 = vmul.f32 %v1560_v28, %v4728_v38  ;;  %v1550_v10 = vld [vmem:[%s4463_s1 + $0x218] sm:$0xff] }
 0x33c   :  { %2288 = vmatmul.mubr.msk.f32.vlgmr.msra.gmra.mxu0 %vm603_vm4, %v4720_v55  ;;  %v4101_v7 = vmul.f32 %v1536_v27, %v4724_v26  ;;  %v1566_v27 = vld [vmem:[%s4463_s1 + $0x298] sm:$0xff]  ;;  %v1945_v61 = vmul.f32 %v4729_v20, %v1378_v41 }
 0x33d   :  { %v1382_v29 = vpop.f32.mrf.mxu1  ;;  %2289 = vmatprep.mubr.msk.f32.mxu0 %vm604_vm3, %v4720_v55  ;;  %v4726_v55 = vld [vmem:[#allocation50_spill] sm:$0xff]  ;;  %v1915_v56 = vmul.f32 %v1566_v27, %v4732_v34 }
 0x33e   :  { %v1850_v63 = vmul.f32 %v4726_v55, %v1382_v29  ;;  %v4731_v29 = vld [vmem:[#allocation33_spill] sm:$0xff]  ;;  %v1570_v41 = vld [vmem:[%s4463_s1 + $0x2b8] sm:$0xff] }
 0x33f   :  { %v1384_v15 = vpop.f32.mrf.mxu1  ;;  %v1913_v19 = vmul.f32 %v1556_v58, %v4731_v29  ;;  %v1817_v28 = vmul.f32 %v1555_v31, %v4731_v29 }
 0x340   :  { %v1946_v53 = vmul.f32 %v4726_v55, %v1384_v15  ;;  %v4733_v55 = vld [vmem:[#allocation49_spill] sm:$0xff]  ;;  %v1882_v20 = vadd.f32 %v1850_v63, %v1818_v37  ;;  %v1816_v63 = vmul.f32 %v1550_v10, %v4730_v25 }
 0x341   :  { %v1388_v42 = vpop.f32.mrf.mxu1  ;;  %v1944_v15 = vmul.f32 %v4733_v55, %v1372_v8  ;;  %v1848_v38 = vmul.f32 %v4733_v55, %v1370_v6  ;;  %v4736_v6 = vld [vmem:[#allocation40_spill] sm:$0xff]  ;;  %v1881_v29 = vadd.f32 %v1849_v49, %v1817_v28  ;;  %v1815_v49 = vmul.f32 %v1545_v4, %v4727_v60 }
 0x342   :  { %v1978_v5 = vadd.f32 %v1946_v53, %v1914_v45  ;;  %v1851_v58 = vmul.f32 %v4734_v17, %v1388_v42  ;;  %v4735_v53 = vld [vmem:[#allocation52_spill] sm:$0xff]  ;;  %v1977_v42 = vadd.f32 %v1945_v61, %v1913_v19  ;;  %v1820_v31 = vmul.f32 %v1570_v41, %v4736_v6  ;;  %v1575_v61 = vld [vmem:[%s4463_s1 + $0x2e0] sm:$0xff]  ;;  %v4737_v19 = vld [vmem:[#allocation54_spill] sm:$0xff] }
 0x343   :  { %v1390_v14 = vpop.f32.mrf.mxu1  ;;  %v1943_v45 = vmul.f32 %v4735_v53, %v4025_v9  ;;  %v1847_v27 = vmul.f32 %v4735_v53, %v4018_v21  ;;  %v1540_v9 = vld [vmem:[%s4463_s1 + $0x1c8] sm:$0xff]  ;;  %v1976_v25 = vadd.f32 %v1944_v15, %v1912_v35  ;;  %v1916_v21 = vmul.f32 %v1571_v24, %v4736_v6 }
 0x344   :  { %v4144_v8 = vadd.f32 %v1851_v58, %v1819_v22  ;;  %v1947_v34 = vmul.f32 %v4734_v17, %v1390_v14  ;;  %2070 = vmatprep.subr.mxu0 %v1978_v5  ;;  %v1942_v22 = vmul.f32 %v4737_v19, %v4012_v39  ;;  %v4738_v17 = vld [vmem:[#allocation59_spill] sm:$0xff]  ;;  %v1846_v41 = vmul.f32 %v4737_v19, %v4006_v0  ;;  %v1576_v35 = vld [vmem:[%s4463_s1 + $0x2e8] sm:$0xff] }
 0x345   :  { %v1394_v37 = vpop.f32.mrf.mxu1  ;;  %2071 = vmatpush1.msra.mxu0 %v1882_v20  ;;  %v1880_v55 = vadd.f32 %v1848_v38, %v1816_v63  ;;  %v1535_v39 = vld [vmem:[%s4463_s1 + $0x1a0] sm:$0xff]  ;;  %v4739_v15 = vld [vmem:[#allocation56_spill] sm:$0xff]  ;;  %v1975_v60 = vadd.f32 %v1943_v45, %v1911_v11  ;;  %v1814_v0 = vmul.f32 %v1540_v9, %v4725_v40  ;;  %v1879_v4 = vadd.f32 %v1847_v27, %v1815_v49  ;;  %v4741_v45 = vld [vmem:[#allocation58_spill] sm:$0xff] }
 0x346   :  { %v4159_v14 = vadd.f32 %v1947_v34, %v1915_v56  ;;  %v1852_v10 = vmul.f32 %v4738_v17, %v1394_v37  ;;  %2072 = vmatprep.subr.mxu0 %v1977_v42  ;;  %v1941_v58 = vmul.f32 %v4739_v15, %v3999_v16  ;;  %v4740_v56 = vld [vmem:[#allocation42_spill] sm:$0xff]  ;;  %v1845_v20 = vmul.f32 %v4739_v15, %v3990_v47  ;;  %v1580_v11 = vld [vmem:[%s4463_s1 + $0x308] sm:$0xff]  ;;  %v4742_v63 = vld [vmem:[#allocation63_spill] sm:$0xff] }
 0x347   :  { %v1396_v5 = vpop.f32.mrf.mxu1  ;;  %2073 = vmatpush1.msra.mxu0 %v1881_v29  ;;  %v1821_v38 = vmul.f32 %v1575_v61, %v4740_v56  ;;  %v1530_v16 = vld [vmem:[%s4463_s1 + $0x178] sm:$0xff]  ;;  %v1940_v42 = vmul.f32 %v4741_v45, %v3978_v46  ;;  %v1974_v40 = vadd.f32 %v1942_v22, %v4104_v59  ;;  %v1813_v6 = vmul.f32 %v1535_v39, %v4724_v26  ;;  %v1525_v46 = vld [vmem:[%s4463_s1 + $0x150] sm:$0xff]  ;;  %v4743_v9 = vld [vmem:[#allocation60_spill] sm:$0xff] }
 0x348   :  { %v4174_v28 = vadd.f32 %v1852_v10, %v1820_v31  ;;  %v1948_v24 = vmul.f32 %v4738_v17, %v1396_v5  ;;  %2074 = vmatprep.subr.mxu0 %v1976_v25  ;;  %v1917_v31 = vmul.f32 %v1576_v35, %v4740_v56  ;;  %v1844_v27 = vmul.f32 %v4741_v45, %v3963_v44  ;;  %v1581_v59 = vld [vmem:[%s4463_s1 + $0x310] sm:$0xff]  ;;  %v4744_v25 = vld [vmem:[#allocation44_spill] sm:$0xff]  ;;  %v4746_v39 = vld [vmem:[#allocation67_spill] sm:$0xff] }
 0x349   :  { %v1400_v53 = vpop.f32.mrf.mxu1  ;;  %2075 = vmatpush1.msra.mxu0 %v1880_v55  ;;  %v1878_v29 = vadd.f32 %v1846_v41, %v1814_v0  ;;  %v1939_v61 = vmul.f32 %v4743_v9, %v3948_v1  ;;  %v1973_v26 = vadd.f32 %v1941_v58, %v4101_v7  ;;  %v1812_v22 = vmul.f32 %v1530_v16, %v4723_v50  ;;  %v1585_v1 = vld [vmem:[%s4463_s1 + $0x330] sm:$0xff]  ;;  %v1520_v7 = vld [vmem:[%s4463_s1 + $0x128] sm:$0xff]  ;;  %v4745_v41 = vld [vmem:[#allocation62_spill] sm:$0xff] }
 0x34a   :  { %v4190_v34 = vadd.f32 %v1948_v24, %v1916_v21  ;;  %v1853_v47 = vmul.f32 %v4742_v63, %v1400_v53  ;;  %2076 = vmatprep.subr.mxu0 %v1975_v60  ;;  %v1822_v17 = vmul.f32 %v1580_v11, %v4744_v25  ;;  %v1843_v10 = vmul.f32 %v4743_v9, %v3930_v12  ;;  %v4747_v0 = vld [vmem:[#allocation64_spill] sm:$0xff] }
 0x34b   :  { %v1402_v37 = vpop.f32.mrf.mxu1  ;;  %2077 = vmatpush1.msra.mxu0 %v1879_v4  ;;  %v1877_v49 = vadd.f32 %v1845_v20, %v1813_v6  ;;  %v1938_v55 = vmul.f32 %v4745_v41, %v3912_v32  ;;  %v1972_v50 = vadd.f32 %v1940_v42, %v4098_v51  ;;  %v1811_v35 = vmul.f32 %v1525_v46, %v3281_v43  ;;  %v1511_v32 = vld [vmem:[%s4463_s1 + $0xe0] sm:$0xff]  ;;  %v1586_v20 = vld [vmem:[%s4463_s1 + $0x338] sm:$0xff]  ;;  %v4750_v6 = vld [vmem:[#allocation69_spill] sm:$0xff] }
 0x34c   :  { %v4206_v19 = vadd.f32 %v1853_v47, %v1821_v38  ;;  %v1949_v44 = vmul.f32 %v4742_v63, %v1402_v37  ;;  %2078 = vmatprep.subr.mxu0 %v1974_v40  ;;  %v1918_v15 = vmul.f32 %v1581_v59, %v4744_v25  ;;  %v1842_v58 = vmul.f32 %v4745_v41, %v3894_v33  ;;  %v1515_v51 = vld [vmem:[%s4463_s1 + $0x100] sm:$0xff]  ;;  %v4748_v4 = vld [vmem:[#allocation46_spill] sm:$0xff] }
 0x34d   :  { %v1406_v21 = vpop.f32.mrf.mxu1  ;;  %2079 = vmatpush1.msra.mxu0 %v1878_v29  ;;  %v1876_v60 = vadd.f32 %v1844_v27, %v1812_v22  ;;  %v1937_v56 = vmul.f32 %v4747_v0, %v3876_v30  ;;  %v1971_v43 = vadd.f32 %v1939_v61, %v4080_v36  ;;  %v1823_v53 = vmul.f32 %v1585_v1, %v4748_v4  ;;  %v1510_v36 = vld [vmem:[%s4463_s1 + $0xd8] sm:$0xff]  ;;  %v4754_v1 = vld [vmem:[#allocation21_spill] sm:$0xff] }
 0x34e   :  { %v4222_v5 = vadd.f32 %v1949_v44, %v1917_v31  ;;  %v1854_v12 = vmul.f32 %v4746_v39, %v1406_v21  ;;  %2080 = vmatprep.subr.mxu0 %v1973_v26  ;;  %v1841_v16 = vmul.f32 %v4747_v0, %v3859_v18  ;;  %v1810_v11 = vmul.f32 %v1520_v7, %v4722_v48  ;;  %v4749_v42 = vld [vmem:[#allocation66_spill] sm:$0xff]  ;;  %v4751_v48 = vld [vmem:[#allocation15_spill] sm:$0xff]  ;;  %v4755_v7 = vld [vmem:[#allocation8_spill] sm:$0xff] }
 0x34f   :  { %v1408_v24 = vpop.f32.mrf.mxu1  ;;  %2081 = vmatpush1.msra.mxu0 %v1877_v49  ;;  %v1875_v45 = vadd.f32 %v1843_v10, %v1811_v35  ;;  %v1936_v40 = vmul.f32 %v4749_v42, %v3843_v54  ;;  %v1970_v63 = vadd.f32 %v1938_v55, %v4095_v3  ;;  %v1840_v18 = vmul.f32 %v4749_v42, %v3829_v57  ;;  %v4752_v10 = vld [vmem:[#allocation6_spill] sm:$0xff]  ;;  %v4753_v49 = vld [vmem:[#allocation4_spill] sm:$0xff]  ;;  %v4756_v55 = vld [vmem:[#allocation23_spill] sm:$0xff] }
 0x350   :  { %v4238_v38 = vadd.f32 %v1854_v12, %v1822_v17  ;;  %v1950_v33 = vmul.f32 %v4746_v39, %v1408_v24  ;;  %2082 = vmatprep.subr.mxu0 %v1972_v50  ;;  %v1904_v27 = vmul.f32 %v1511_v32, %v4751_v48  ;;  %v1809_v29 = vmul.f32 %v1515_v51, %v3243_v23  ;;  %v4757_v50 = vld [vmem:[#allocation12_spill] sm:$0xff]  ;;  %v4759_v12 = vld [vmem:[#allocation5_spill] sm:$0xff] }
 0x351   :  { %v1412_v30 = vpop.f32.mrf.mxu1  ;;  %2083 = vmatpush1.msra.mxu0 %v1876_v60  ;;  %v1874_v37 = vadd.f32 %v1842_v58, %v1810_v11  ;;  %v1919_v59 = vmul.f32 %v1586_v20, %v4748_v4  ;;  %v1969_v54 = vadd.f32 %v1937_v56, %v4092_v2  ;;  %v1808_v61 = vmul.f32 %v1510_v36, %v4751_v48  ;;  %v4761_v36 = vld [vmem:[#allocation10_spill] sm:$0xff] }
 0x352   :  { %v4254_v47 = vadd.f32 %v1950_v33, %v1918_v15  ;;  %v1855_v31 = vmul.f32 %v4750_v6, %v1412_v30  ;;  %2084 = vmatprep.subr.mxu0 %v1971_v43  ;;  %v1873_v26 = vadd.f32 %v1841_v16, %v1809_v29  ;;  %v1968_v44 = vadd.f32 %v1936_v40, %v1904_v27  ;;  %v4760_v15 = vld [vmem:[#allocation29_spill] sm:$0xff]  ;;  %v1636_v30 = vld [vmem:[%s4463_s1 + $0x4c8] sm:$0xff]  ;;  %v1631_v29 = vld [vmem:[%s4463_s1 + $0x4a0] sm:$0xff] }
 0x353   :  { %v1414_v46 = vpop.f32.mrf.mxu1  ;;  %2085 = vmatpush1.msra.mxu0 %v1875_v45  ;;  %v1872_v22 = vadd.f32 %v1840_v18, %v1808_v61  ;;  %v1641_v16 = vld [vmem:[%s4463_s1 + $0x4f0] sm:$0xff]  ;;  %v1640_v45 = vld [vmem:[%s4463_s1 + $0x4e8] sm:$0xff]  ;;  %v4763_v18 = vld [vmem:[#allocation18_spill] sm:$0xff] }
 0x354   :  { %v4263_v3 = vadd.f32 %v1855_v31, %v1823_v53  ;;  %v1951_v9 = vmul.f32 %v4750_v6, %v1414_v46  ;;  %2086 = vmatprep.subr.mxu0 %v1970_v63  ;;  %v1635_v63 = vld [vmem:[%s4463_s1 + $0x4c0] sm:$0xff]  ;;  %v4762_v6 = vld [vmem:[#allocation9_spill] sm:$0xff] }
 0x355   :  { %v4267_v57 = vpop.f32.mrf.mxu1  ;;  %2087 = vmatpush1.msra.mxu0 %v1874_v37  ;;  %v1930_v31 = vmul.f32 %v1641_v16, %v4762_v6  ;;  %v1834_v37 = vmul.f32 %v1640_v45, %v4762_v6  ;;  %v4767_v16 = vld [vmem:[#allocation14_spill] sm:$0xff]  ;;  %v1616_v45 = vld [vmem:[%s4463_s1 + $0x428] sm:$0xff] }
 0x356   :  { %v4269_v23 = vadd.f32 %v1951_v9, %v1919_v59  ;;  %2088 = vmatprep.subr.mxu0 %v1969_v54  ;;  %v1630_v59 = vld [vmem:[%s4463_s1 + $0x498] sm:$0xff]  ;;  %v1929_v54 = vmul.f32 %v1636_v30, %v3722_v52  ;;  %v4764_v9 = vld [vmem:[#allocation17_spill] sm:$0xff] }
 0x357   :  { %v4271_v25 = vpop.f32.mrf.mxu1  ;;  %2089 = vmatpush1.msra.mxu0 %v1873_v26 }
 0x358   :  { %2090 = vmatprep.subr.mxu0 %v1968_v44  ;;  %v1626_v44 = vld [vmem:[%s4463_s1 + $0x478] sm:$0xff] }
 0x359   :  { %v4273_v2 = vpop.f32.mrf.mxu1  ;;  %2091 = vmatpush1.msra.mxu0 %v1872_v22  ;;  %v1833_v22 = vmul.f32 %v1635_v63, %v3722_v52  ;;  %v4769_v63 = vld [vmem:[#allocation22_spill] sm:$0xff] }
 0x35a   :  { %2092 = vmatprep.subr.mxu0 %v3833_v13  ;;  %v4758_v13 = vld [vmem:[#allocation26_spill] sm:$0xff] }
 0x35b   :  { %v4276_v17 = vpop.f32.mrf.mxu1  ;;  %2093 = vmatpush1.msra.mxu0 %v4752_v10 }
 0x35c   :  { %2094 = vmatprep.subr.mxu0 %v4753_v49 }
 0x35d   :  { %v4280_v21 = vpop.f32.mrf.mxu1  ;;  %2095 = vmatpush1.msra.mxu0 %v4754_v1  ;;  %v1625_v1 = vld [vmem:[%s4463_s1 + $0x470] sm:$0xff] }
 0x35e   :  { %2096 = vmatprep.subr.mxu0 %v4755_v7  ;;  %v1928_v7 = vmul.f32 %v1631_v29, %v3711_v62  ;;  %v4770_v29 = vld [vmem:[#allocation70_spill] sm:$0xff] }
 0x35f   :  { %v4284_v41 = vpop.f32.mrf.mxu1  ;;  %2097 = vmatpush1.msra.mxu0 %v4756_v55  ;;  %v4765_v55 = vld [vmem:[#allocation19_spill] sm:$0xff] }
 0x360   :  { %2098 = vmatprep.subr.mxu0 %v4757_v50 }
 0x361   :  { %v4288_v39 = vpop.f32.mrf.mxu1  ;;  %2099 = vmatpush1.msra.mxu0 %v4758_v13 }
 0x362   :  { %2100 = vmatprep.subr.mxu0 %v4759_v12  ;;  %v1621_v12 = vld [vmem:[%s4463_s1 + $0x450] sm:$0xff] }
 0x363   :  { %v4292_v35 = vpop.f32.mrf.mxu1  ;;  %2101 = vmatpush1.msra.mxu0 %v4760_v15  ;;  %v1832_v15 = vmul.f32 %v1630_v59, %v3711_v62 }
 0x365   :  { %v4295_v58 = vpop.f32.mrf.mxu1 }
 0x367   :  { %v4297_v60 = vpop.f32.mrf.mxu1 }
 0x369   :  { %v1448_v24 = vpop.f32.mrf.mxu1 }
 0x36b   :  { %v1450_v32 = vpop.f32.mrf.mxu1 }
 0x36d   :  { %v1454_v51 = vpop.f32.mrf.mxu1 }
 0x36f   :  { %v1456_v0 = vpop.f32.mrf.mxu1 }
 0x371   :  { %v1460_v56 = vpop.f32.mrf.mxu1 }
 0x372   :  { %v1863_v52 = vmul.f32 %v4765_v55, %v1460_v56  ;;  %v1862_v56 = vmul.f32 %v4767_v16, %v1454_v51  ;;  %v1861_v51 = vmul.f32 %v4769_v63, %v1448_v24 }
 0x373   :  { %v1462_v43 = vpop.f32.mrf.mxu1 }
 0x374   :  { %v1959_v50 = vmul.f32 %v4765_v55, %v1462_v43  ;;  %v1958_v43 = vmul.f32 %v4767_v16, %v1456_v0  ;;  %v1957_v0 = vmul.f32 %v4769_v63, %v1450_v32  ;;  %v4771_v32 = vld [vmem:[#allocation7_spill] sm:$0xff]  ;;  %v4776_v16 = vld [vmem:[#allocation61_spill] sm:$0xff] }
 0x375   :  { %v1466_v33 = vpop.f32.mrf.mxu1  ;;  %v1860_v24 = vmul.f32 %v4771_v32, %v4295_v58 }
 0x376   :  { %v1864_v10 = vmul.f32 %v4764_v9, %v1466_v33 }
 0x377   :  { %v1468_v20 = vpop.f32.mrf.mxu1 }
 0x378   :  { %v1960_v61 = vmul.f32 %v4764_v9, %v1468_v20  ;;  %v1620_v20 = vld [vmem:[%s4463_s1 + $0x448] sm:$0xff]  ;;  %v1896_v30 = vadd.f32 %v1864_v10, %v1832_v15 }
 0x379   :  { %v1472_v4 = vpop.f32.mrf.mxu1 }
 0x37a   :  { %v1865_v46 = vmul.f32 %v4763_v18, %v1472_v4  ;;  %v4766_v4 = vld [vmem:[#allocation13_spill] sm:$0xff] }
 0x37b   :  { %v1474_v53 = vpop.f32.mrf.mxu1  ;;  %v1831_v62 = vmul.f32 %v1625_v1, %v4766_v4  ;;  %v1601_v1 = vld [vmem:[%s4463_s1 + $0x3b0] sm:$0xff] }
 0x37c   :  { %v1961_v48 = vmul.f32 %v4763_v18, %v1474_v53  ;;  %v1897_v33 = vadd.f32 %v1865_v46, %v1833_v22  ;;  %v1927_v53 = vmul.f32 %v1626_v44, %v4766_v4  ;;  %v1956_v46 = vmul.f32 %v4771_v32, %v4297_v60  ;;  %v4772_v44 = vld [vmem:[#allocation68_spill] sm:$0xff] }
 0x37d   :  { %v1478_v11 = vpop.f32.mrf.mxu1  ;;  %v4773_v60 = vld [vmem:[#allocation24_spill] sm:$0xff] }
 0x37e   :  { %v1866_v42 = vmul.f32 %v4761_v36, %v1478_v11  ;;  %v1993_v13 = vadd.f32 %v1961_v48, %v1929_v54  ;;  %v1992_v11 = vadd.f32 %v1960_v61, %v1928_v7  ;;  %v1991_v6 = vadd.f32 %v1959_v50, %v1927_v53  ;;  %v1606_v54 = vld [vmem:[%s4463_s1 + $0x3d8] sm:$0xff]  ;;  %v1600_v50 = vld [vmem:[%s4463_s1 + $0x3a8] sm:$0xff]  ;;  %v1595_v53 = vld [vmem:[%s4463_s1 + $0x380] sm:$0xff] }
 0x37f   :  { %v1480_v40 = vpop.f32.mrf.mxu1  ;;  %v1895_v48 = vadd.f32 %v1863_v52, %v1831_v62  ;;  %v1955_v10 = vmul.f32 %v4773_v60, %v4292_v35  ;;  %v1859_v58 = vmul.f32 %v4773_v60, %v4288_v39  ;;  %v4775_v35 = vld [vmem:[#allocation11_spill] sm:$0xff] }
 0x380   :  { %v1962_v27 = vmul.f32 %v4761_v36, %v1480_v40  ;;  %v1898_v49 = vadd.f32 %v1866_v42, %v1834_v37  ;;  %v1615_v36 = vld [vmem:[%s4463_s1 + $0x420] sm:$0xff]  ;;  %v4768_v42 = vld [vmem:[#allocation16_spill] sm:$0xff]  ;;  %v1925_v37 = vmul.f32 %v1616_v45, %v4770_v29  ;;  %v1954_v15 = vmul.f32 %v4775_v35, %v4284_v41 }
 0x381   :  { %v1926_v40 = vmul.f32 %v1621_v12, %v4768_v42  ;;  %v1830_v18 = vmul.f32 %v1620_v20, %v4768_v42  ;;  %v1829_v9 = vmul.f32 %v1615_v36, %v4770_v29  ;;  %v1858_v39 = vmul.f32 %v4775_v35, %v4280_v21  ;;  %v4777_v41 = vld [vmem:[#allocation27_spill] sm:$0xff]  ;;  %v1590_v36 = vld [vmem:[%s4463_s1 + $0x358] sm:$0xff]  ;;  %v4778_v42 = vld [vmem:[#allocation57_spill] sm:$0xff] }
 0x382   :  { %v1994_v26 = vadd.f32 %v1962_v27, %v1930_v31  ;;  %v1611_v31 = vld [vmem:[%s4463_s1 + $0x400] sm:$0xff]  ;;  %v1610_v27 = vld [vmem:[%s4463_s1 + $0x3f8] sm:$0xff]  ;;  %v1857_v21 = vmul.f32 %v4777_v41, %v4273_v2 }
 0x383   :  { %v1990_v59 = vadd.f32 %v1958_v43, %v1926_v40  ;;  %v1894_v61 = vadd.f32 %v1862_v56, %v1830_v18  ;;  %v1924_v22 = vmul.f32 %v1611_v31, %v4772_v44  ;;  %v1828_v7 = vmul.f32 %v1610_v27, %v4772_v44  ;;  %v1591_v62 = vld [vmem:[%s4463_s1 + $0x360] sm:$0xff] }
 0x384   :  { %2102 = vmatprep.subr.mxu0 %v1994_v26  ;;  %v1605_v26 = vld [vmem:[%s4463_s1 + $0x3d0] sm:$0xff]  ;;  %v1893_v55 = vadd.f32 %v1861_v51, %v1829_v9  ;;  %v1922_v43 = vmul.f32 %v1601_v1, %v4776_v16  ;;  %v1826_v56 = vmul.f32 %v1600_v50, %v4776_v16  ;;  %v4780_v2 = vld [vmem:[#allocation51_spill] sm:$0xff] }
 0x385   :  { %2103 = vmatpush2.msra.mxu0 %v1898_v49  ;;  %v1989_v49 = vadd.f32 %v1957_v0, %v1925_v37  ;;  %v1988_v52 = vadd.f32 %v1956_v46, %v1924_v22  ;;  %v1892_v4 = vadd.f32 %v1860_v24, %v1828_v7  ;;  %v1920_v51 = vmul.f32 %v1591_v62, %v4780_v2 }
 0x386   :  { %2104 = vmatprep.subr.mxu0 %v1993_v13  ;;  %v4774_v13 = vld [vmem:[#allocation65_spill] sm:$0xff]  ;;  %v1986_v0 = vadd.f32 %v1954_v15, %v1922_v43  ;;  %v1890_v18 = vadd.f32 %v1858_v39, %v1826_v56  ;;  %v1824_v27 = vmul.f32 %v1590_v36, %v4780_v2 }
 0x387   :  { %2105 = vmatpush2.msra.mxu0 %v1897_v33  ;;  %v1923_v12 = vmul.f32 %v1606_v54, %v4774_v13  ;;  %v1596_v33 = vld [vmem:[%s4463_s1 + $0x388] sm:$0xff]  ;;  %v1827_v20 = vmul.f32 %v1605_v26, %v4774_v13 }
 0x388   :  { %2106 = vmatprep.subr.mxu0 %v1992_v11  ;;  %v1953_v11 = vmul.f32 %v4777_v41, %v4276_v17  ;;  %v1921_v40 = vmul.f32 %v1596_v33, %v4778_v42  ;;  %v4779_v17 = vld [vmem:[#allocation71_spill] sm:$0xff] }
 0x389   :  { %2107 = vmatpush2.msra.mxu0 %v1896_v30  ;;  %v1987_v45 = vadd.f32 %v1955_v10, %v1923_v12  ;;  %v1891_v30 = vadd.f32 %v1859_v58, %v1827_v20  ;;  %v1952_v63 = vmul.f32 %v4779_v17, %v4271_v25  ;;  %v1856_v31 = vmul.f32 %v4779_v17, %v4267_v57 }
 0x38a   :  { %2108 = vmatprep.subr.mxu0 %v1991_v6  ;;  %v1825_v6 = vmul.f32 %v1595_v53, %v4778_v42  ;;  %v4781_v57 = vmov 1.0  }
 0x38b   :  { %2109 = vmatpush2.msra.mxu0 %v1895_v48  ;;  %v1985_v48 = vadd.f32 %v1953_v11, %v1921_v40  ;;  %v1984_v37 = vadd.f32 %v1952_v63, %v1920_v51  ;;  %v1888_v25 = vadd.f32 %v1856_v31, %v1824_v27 }
 0x38c   :  { %2110 = vmatprep.subr.mxu0 %v1990_v59  ;;  %v1889_v29 = vadd.f32 %v1857_v21, %v1825_v6 }
 0x38d   :  { %2111 = vmatpush2.msra.mxu0 %v1894_v61 }
 0x38e   :  { %2112 = vmatprep.subr.mxu0 %v1989_v49 }
 0x38f   :  { %2113 = vmatpush2.msra.mxu0 %v1893_v55 }
 0x390   :  { %2114 = vmatprep.subr.mxu0 %v1988_v52 }
 0x391   :  { %2115 = vmatpush2.msra.mxu0 %v1892_v4 }
 0x392   :  { %2116 = vmatprep.subr.mxu0 %v1987_v45 }
 0x393   :  { %2117 = vmatpush2.msra.mxu0 %v1891_v30 }
 0x394   :  { %2118 = vmatprep.subr.mxu0 %v1986_v0 }
 0x395   :  { %2119 = vmatpush2.msra.mxu0 %v1890_v18 }
 0x396   :  { %2120 = vmatprep.subr.mxu0 %v1985_v48 }
 0x397   :  { %2121 = vmatpush2.msra.mxu0 %v1889_v29 }
 0x398   :  { %2122 = vmatprep.subr.mxu0 %v1984_v37 }
 0x399   :  { %2123 = vmatpush2.msra.mxu0 %v1888_v25 }
 0x39a   :  { %2124 = vmatprep.subr.mxu0 %v4269_v23 }
 0x39b   :  { %2125 = vmatpush2.msra.mxu0 %v4263_v3  ;;  %v358_v3 = vld [vmem:[%s4458_s0 + $0x18] sm:$0xff] }
 0x39c   :  { %2126 = vmatprep.subr.mxu0 %v4254_v47 }
 0x39d   :  { %2127 = vmatpush2.msra.mxu0 %v4238_v38  ;;  %v355_v38 = vld [vmem:[%s4458_s0] sm:$0xff] }
 0x39e   :  { %2128 = vmatprep.subr.mxu0 %v4222_v5 }
 0x39f   :  { %2129 = vmatpush2.msra.mxu0 %v4206_v19 }
 0x3a0   :  { %2130 = vmatprep.subr.mxu0 %v4190_v34  ;;  %v356_v34 = vld [vmem:[%s4458_s0 + $0x8] sm:$0xff] }
 0x3a1   :  { %2131 = vmatpush2.msra.mxu0 %v4174_v28 }
 0x3a2   :  { %2132 = vmatprep.subr.mxu0 %v4159_v14  ;;  %v357_v14 = vld [vmem:[%s4458_s0 + $0x10] sm:$0xff] }
 0x3a3   :  { %2133 = vmatpush2.msra.mxu0 %v4144_v8 }
 0x3a4   :  { %2290 = vmatmul.mubr.msk.f32.vlgmr.msra.gmra.mxu0 %vm603_vm4, %v4781_v57 }
 0x3fc   :  { %v2065_v5 = vpop.f32.mrf.mxu0 }
 0x3fd   :  { %v2141_v19 = vadd.f32 %v2065_v5, %v355_v38 }
 0x3fe   :  { %v2067_v28 = vpop.f32.mrf.mxu0 }
 0x3ff   :  { %2145 = vst [vmem:[%s4465_s8] sm:$0xff] %v2141_v19  ;;  %v2142_v8 = vadd.f32 %v2067_v28, %v356_v34 }
 0x401   :  { %2146 = vst [vmem:[%s4465_s8 + $0x8] sm:$0xff] %v2142_v8 }
 0x464   :  { %v2136_v47 = vpop.f32.mrf.mxu0 }
 0x465   :  { %v2143_v46 = vadd.f32 %v2136_v47, %v357_v14 }
 0x466   :  { %v2138_v59 = vpop.f32.mrf.mxu0 }
 0x467   :  { %2147 = vst [vmem:[%s4465_s8 + $0x10] sm:$0xff] %v2143_v46  ;;  %v2144_v54 = vadd.f32 %v2138_v59, %v358_v3 }
 0x469   :  { %2148 = vst [vmem:[%s4465_s8 + $0x18] sm:$0xff] %v2144_v54 }

</bundles_post_ra>
